<compile_context>
chip_gen: v7x
topology: tpu7x:2x2x1
jax: 0.10.0
libtpu: 0.0.40
codegen_flags: <defaults>
</compile_context>

<pallas_src>
import functools

import jax
import jax.numpy as jnp
import numpy as np
from jax import lax
from jax.experimental import pallas as pl
from jax.experimental.pallas import tpu as pltpu

NEG_SLOPE = 0.01  # PyTorch nn.LeakyReLU default negative_slope
BN_EPS = 1e-5     # PyTorch nn.BatchNorm2d default eps


def _block_kernel(x_ref, a1_ref, s1_ref, b1_ref, a2_ref, s2_ref, b2_ref,
                  mask_ref, sel_ref, o_ref, mid_ref, *, W, strip_h, n_strips):
    # x_ref:    (1, 1, Cin, (Hs+4)*Wp) zero-padded input strip (bf16, flat rows)
    # a*_ref:   (9, Cout, C)           per-tap conv weights (bf16)
    # s*/b*:    (Cout, 1)              folded BN scale / bias (f32, conv bias in)
    # mask_ref: (1, Lc1)               1.0 on valid pixels, 0.0 on pad columns
    # sel_ref:  (W-1, Wo)              0/1 stride-2 column-selection matrix
    # o_ref:    (1, Cout, (Hs/2)*Wo)   pooled output for this strip
    # mid_ref:  (Cout, (Hs+2)*Wp)      zero-col-padded conv1 output (bf16)
    Hs = strip_h
    Wp = W + 2
    Hm = Hs + 2                      # conv1 rows: strip rows + 1-row halo each side
    Lc1 = Hm * Wp - 2                # contiguous compute range for conv1
    Lc2 = Hs * Wp - 2                # contiguous compute range for conv2
    Wo = W // 2
    Ho_s = Hs // 2
    Cout = o_ref.shape[1]
    s = pl.program_id(1)

    def conv3x3(load_slice, a_ref, length):
        # 9 accumulating K=C matmuls on lane-shifted slices (no im2col scratch).
        acc = None
        for dy in range(3):
            for dx in range(3):
                off = dy * Wp + dx
                part = jnp.dot(a_ref[dy * 3 + dx], load_slice(off, length),
                               preferred_element_type=jnp.float32)
                acc = part if acc is None else acc + part
        return acc

    # ---- conv1 + folded BN + LeakyReLU over strip rows + 1-row halo ----
    y = conv3x3(lambda o, n: x_ref[0, 0, :, o:o + n], a1_ref, Lc1)
    y = y * s1_ref[...] + b1_ref[...]
    y = jnp.where(y > 0, y, NEG_SLOPE * y)
    # Masked write into the column-padded intermediate (mask zeroes the pad
    # columns that fall inside the contiguous compute range).
    mid_ref[:, 1:1 + Lc1] = (y * mask_ref[...]).astype(mid_ref.dtype)
    # The two corner pad columns not covered by the write above — zeroed every
    # step so the kernel is stateless across grid steps (parallel-safe).
    zc = jnp.zeros((Cout, 1), mid_ref.dtype)
    mid_ref[:, 0:1] = zc
    mid_ref[:, Hm * Wp - 1:] = zc

    # conv2's zero row-padding at the image top / bottom.
    @pl.when(s == 0)
    def _():
        mid_ref[:, 0:Wp] = jnp.zeros((Cout, Wp), mid_ref.dtype)

    @pl.when(s == n_strips - 1)
    def _():
        mid_ref[:, (Hm - 1) * Wp:] = jnp.zeros((Cout, Wp), mid_ref.dtype)

    # ---- conv2 + folded BN + LeakyReLU over the strip rows ----
    z = conv3x3(lambda o, n: mid_ref[:, o:o + n], a2_ref, Lc2)
    z = z * s2_ref[...] + b2_ref[...]
    z = jnp.where(z > 0, z, NEG_SLOPE * z)

    # ---- MaxPool2d(2, 2): two lane-shifted maxima give the 2x2-block max at
    #      every pixel; one batched 0/1 selection matmul does the stride-2
    #      column pick for ALL pooled rows of the strip at once. ----
    zv = jnp.maximum(z[:, :Lc2 - Wp], z[:, Wp:])      # rows h, h+1
    zh = jnp.maximum(zv[:, :-1], zv[:, 1:])           # cols w, w+1
    rows = [zh[:, 2 * jo * Wp:2 * jo * Wp + (W - 1)] for jo in range(Ho_s)]
    stacked = jnp.concatenate(rows, axis=0)           # (Ho_s*Cout, W-1) f32
    res = jnp.dot(stacked, sel_ref[...], preferred_element_type=jnp.float32)
    for jo in range(Ho_s):
        o_ref[0, :, jo * Wo:(jo + 1) * Wo] = (
            res[jo * Cout:(jo + 1) * Cout, :].astype(o_ref.dtype))


def _fold_bn(conv_bias, gamma, beta, mean, var):
    scale = gamma / jnp.sqrt(var + BN_EPS)
    bias = beta + scale * (conv_bias - mean)
    return scale, bias


def _choose_strip_h(H, W, cin, cout, budget_bytes=20 * 1024 * 1024):
    """Largest even divisor of H whose per-strip VMEM estimate fits the budget
    and whose per-strip pooled output length is lane-aligned (or full)."""
    Wp = W + 2
    cands = [hs for hs in range(H, 1, -1)
             if H % hs == 0 and hs % 2 == 0
             and (hs == H or ((hs // 2) * (W // 2)) % 128 == 0)]
    for hs in cands:
        ls = (hs + 4) * Wp
        est = (2 * cin * ls * 2                     # double-buffered bf16 input
               + cout * (hs + 2) * Wp * 2           # bf16 mid scratch
               + 2 * cout * (hs // 2) * (W // 2) * 4  # double-buffered output
               + 4 * cout * (hs + 2) * Wp * 4)      # f32 conv/pool temporaries
        if est <= budget_bytes:
            return hs
    return cands[-1] if cands else H


def block_forward(x_nchw, params, strip_h=None):
    (w1, cb1, g1, be1, m1, v1, w2, cb2, g2, be2, m2, v2) = params
    s1, b1 = _fold_bn(cb1, g1, be1, m1, v1)
    s2, b2 = _fold_bn(cb2, g2, be2, m2, v2)

    N, Cin, H, W = x_nchw.shape
    assert H % 2 == 0 and W % 2 == 0, "MaxPool2d(2,2) path assumes even H, W"
    Cout = w1.shape[-1]
    Wp = W + 2
    Ho, Wo = H // 2, W // 2

    if strip_h is None:
        strip_h = _choose_strip_h(H, W, Cin, Cout)
    Hs = strip_h
    assert H % Hs == 0 and Hs % 2 == 0, "strip_h must be an even divisor of H"
    n_strips = H // Hs
    Po = (Hs // 2) * Wo
    assert n_strips == 1 or Po % 128 == 0, "per-strip output must be lane-aligned"
    Ls = (Hs + 4) * Wp
    Lc1 = (Hs + 2) * Wp - 2

    # bf16 activations; zero-pad (2 rows top/bottom for the two stacked 3x3
    # convs, 1 col left/right) and gather overlapping row strips so BlockSpec
    # can deliver each padded strip with plain (auto-pipelined) tiling.
    x_pad = jnp.pad(x_nchw.astype(jnp.bfloat16), ((0, 0), (0, 0), (2, 2), (1, 1)))
    row_idx = jnp.arange(n_strips)[:, None] * Hs + jnp.arange(Hs + 4)[None, :]
    x_strips = jnp.transpose(x_pad[:, :, row_idx, :], (0, 2, 1, 3, 4))
    x_strips = x_strips.reshape(N, n_strips, Cin, Ls)

    # Conv weights (HWIO) -> (9, Cout, Cin) per-tap matrices, bf16.
    a1 = jnp.transpose(w1.reshape(9, Cin, Cout), (0, 2, 1)).astype(jnp.bfloat16)
    a2 = jnp.transpose(w2.reshape(9, Cout, Cout), (0, 2, 1)).astype(jnp.bfloat16)
    s1 = s1.reshape(Cout, 1).astype(jnp.float32)
    b1 = b1.reshape(Cout, 1).astype(jnp.float32)
    s2 = s2.reshape(Cout, 1).astype(jnp.float32)
    b2 = b2.reshape(Cout, 1).astype(jnp.float32)

    # Constant operands hoisted out of the kernel.
    mask = ((jnp.arange(Lc1, dtype=jnp.int32) % Wp) < W)
    mask = mask.astype(jnp.float32).reshape(1, Lc1)
    sel = (jnp.arange(W - 1, dtype=jnp.int32)[:, None]
           == 2 * jnp.arange(Wo, dtype=jnp.int32)[None, :]).astype(jnp.float32)

    kernel = functools.partial(_block_kernel, W=W, strip_h=Hs, n_strips=n_strips)

    vmem_est = (2 * Cin * Ls * 2 + Cout * (Hs + 2) * Wp * 2
                + 2 * Cout * Po * 4 + 4 * Cout * (Hs + 2) * Wp * 4
                + 9 * Cout * (Cin + Cout) * 2 + (Lc1 + (W - 1) * Wo) * 4)
    vmem_limit = int(min(64 * 1024 * 1024, max(32 * 1024 * 1024, 2 * vmem_est)))

    flops = (N * 2 * 9 * Cout * H * W * (Cin + Cout)
             + N * 2 * Ho * Cout * (W - 1) * Wo)
    bytes_accessed = int(x_strips.size * 2 + (a1.size + a2.size) * 2
                         + N * Cout * Ho * Wo * 4)

    out_flat = pl.pallas_call(
        kernel,
        out_shape=jax.ShapeDtypeStruct((N, Cout, Ho * Wo), jnp.float32),
        grid_spec=pltpu.PrefetchScalarGridSpec(
            num_scalar_prefetch=0,
            grid=(N, n_strips),
            in_specs=[
                pl.BlockSpec((1, 1, Cin, Ls), lambda n, s: (n, s, 0, 0)),
                pl.BlockSpec((9, Cout, Cin), lambda n, s: (0, 0, 0)),
                pl.BlockSpec((Cout, 1), lambda n, s: (0, 0)),
                pl.BlockSpec((Cout, 1), lambda n, s: (0, 0)),
                pl.BlockSpec((9, Cout, Cout), lambda n, s: (0, 0, 0)),
                pl.BlockSpec((Cout, 1), lambda n, s: (0, 0)),
                pl.BlockSpec((Cout, 1), lambda n, s: (0, 0)),
                pl.BlockSpec((1, Lc1), lambda n, s: (0, 0)),
                pl.BlockSpec((W - 1, Wo), lambda n, s: (0, 0)),
            ],
            out_specs=pl.BlockSpec((1, Cout, Po), lambda n, s: (n, 0, s)),
            scratch_shapes=[pltpu.VMEM((Cout, (Hs + 2) * Wp), jnp.bfloat16)],
        ),
        # Kernel is stateless across grid steps (all scratch rewritten every
        # step), so both axes can be sharded across cores (v7x megacore).
        compiler_params=pltpu.CompilerParams(
            dimension_semantics=("parallel", "parallel"),
            vmem_limit_bytes=vmem_limit),
        cost_estimate=pl.CostEstimate(flops=flops, transcendentals=0,
                                      bytes_accessed=bytes_accessed),
    )(x_strips, a1, s1, b1, a2, s2, b2, mask, sel)

    return out_flat.reshape(N, Cout, Ho, Wo)


def _leaky(x):
    return jnp.where(x > 0, x, NEG_SLOPE * x)


def block_reference(x_nchw, params):
    """Pure-JAX reference (f32) for correctness checking."""
    (w1, cb1, g1, be1, m1, v1, w2, cb2, g2, be2, m2, v2) = params
    dn = ('NHWC', 'HWIO', 'NHWC')
    x = jnp.transpose(x_nchw, (0, 2, 3, 1))
    y = lax.conv_general_dilated(x, w1, (1, 1), 'SAME', dimension_numbers=dn,
                                 precision=lax.Precision.HIGHEST) + cb1
    y = (y - m1) / jnp.sqrt(v1 + BN_EPS) * g1 + be1
    y = _leaky(y)
    y = lax.conv_general_dilated(y, w2, (1, 1), 'SAME', dimension_numbers=dn,
                                 precision=lax.Precision.HIGHEST) + cb2
    y = (y - m2) / jnp.sqrt(v2 + BN_EPS) * g2 + be2
    y = _leaky(y)
    y = lax.reduce_window(y, -jnp.inf, lax.max,
                          (1, 2, 2, 1), (1, 2, 2, 1), 'VALID')
    return jnp.transpose(y, (0, 3, 1, 2))


if __name__ == "__main__":
    key = jax.random.PRNGKey(0)
    N, Cin, Cout, H, W = 2, 4, 8, 32, 32
    ks = jax.random.split(key, 13)

    x = jax.random.normal(ks[0], (N, Cin, H, W), jnp.float32)

    w1 = 0.1 * jax.random.normal(ks[1], (3, 3, Cin, Cout), jnp.float32)
    cb1 = 0.1 * jax.random.normal(ks[2], (Cout,), jnp.float32)
    g1 = 1.0 + 0.1 * jax.random.normal(ks[3], (Cout,), jnp.float32)
    be1 = 0.1 * jax.random.normal(ks[4], (Cout,), jnp.float32)
    m1 = 0.1 * jax.random.normal(ks[5], (Cout,), jnp.float32)
    v1 = jnp.abs(jax.random.normal(ks[6], (Cout,), jnp.float32)) + 0.5

    w2 = 0.1 * jax.random.normal(ks[7], (3, 3, Cout, Cout), jnp.float32)
    cb2 = 0.1 * jax.random.normal(ks[8], (Cout,), jnp.float32)
    g2 = 1.0 + 0.1 * jax.random.normal(ks[9], (Cout,), jnp.float32)
    be2 = 0.1 * jax.random.normal(ks[10], (Cout,), jnp.float32)
    m2 = 0.1 * jax.random.normal(ks[11], (Cout,), jnp.float32)
    v2 = jnp.abs(jax.random.normal(ks[12], (Cout,), jnp.float32)) + 0.5

    params = (w1, cb1, g1, be1, m1, v1, w2, cb2, g2, be2, m2, v2)

    # Reference computed from the same bf16-quantized x / conv weights the
    # kernel consumes (BN params stay f32), so the comparison isolates kernel
    # logic from the intentional bf16 input quantization.
    xq = x.astype(jnp.bfloat16).astype(jnp.float32)
    w1q = w1.astype(jnp.bfloat16).astype(jnp.float32)
    w2q = w2.astype(jnp.bfloat16).astype(jnp.float32)
    params_q = (w1q, cb1, g1, be1, m1, v1, w2q, cb2, g2, be2, m2, v2)
    ref = block_reference(xq, params_q)

    # Exercise both the multi-strip path (strip_h=16 -> 2 strips) and the
    # auto-selected single-strip path.
    for sh in (16, None):
        out = jax.block_until_ready(block_forward(x, params, strip_h=sh))
        assert out.shape == (N, Cout, H // 2, W // 2), out.shape
        np.testing.assert_allclose(np.asarray(out), np.asarray(ref),
                                   atol=3e-2, rtol=3e-2)
    print("KERNEL_OK")
</pallas_src>

<mosaic_0001>
module attributes {stable_mosaic.version = 11 : i64} {
  func.func @_block_kernel(%arg0: i32, %arg1: i32, %arg2: memref<1x1x4x680xbf16, #tpu.memory_space<vmem>>, %arg3: memref<9x8x4xbf16, #tpu.memory_space<vmem>>, %arg4: memref<8x1xf32, #tpu.memory_space<vmem>>, %arg5: memref<8x1xf32, #tpu.memory_space<vmem>>, %arg6: memref<9x8x8xbf16, #tpu.memory_space<vmem>>, %arg7: memref<8x1xf32, #tpu.memory_space<vmem>>, %arg8: memref<8x1xf32, #tpu.memory_space<vmem>>, %arg9: memref<1x610xf32, #tpu.memory_space<vmem>>, %arg10: memref<31x16xf32, #tpu.memory_space<vmem>>, %arg11: memref<1x8x128xf32, #tpu.memory_space<vmem>>, %arg12: memref<8x612xbf16, #tpu.memory_space<vmem>>) attributes {dimension_semantics = [#tpu.dimension_semantics<parallel>, #tpu.dimension_semantics<parallel>], iteration_bounds = array<i64: 2, 2>, scalar_prefetch = 0 : i64, scratch_operands = 1 : i64, tpu.core_type = #tpu.core_type<tc>, window_params = [{transform_indices = @transform_0, window_bounds = array<i64: 1, 1, 4, 680>}, {pipeline_mode = #tpu.pipeline_mode<synchronous>, transform_indices = @transform_1, window_bounds = array<i64: 9, 8, 4>}, {pipeline_mode = #tpu.pipeline_mode<synchronous>, transform_indices = @transform_2, window_bounds = array<i64: 8, 1>}, {pipeline_mode = #tpu.pipeline_mode<synchronous>, transform_indices = @transform_3, window_bounds = array<i64: 8, 1>}, {pipeline_mode = #tpu.pipeline_mode<synchronous>, transform_indices = @transform_4, window_bounds = array<i64: 9, 8, 8>}, {pipeline_mode = #tpu.pipeline_mode<synchronous>, transform_indices = @transform_5, window_bounds = array<i64: 8, 1>}, {pipeline_mode = #tpu.pipeline_mode<synchronous>, transform_indices = @transform_6, window_bounds = array<i64: 8, 1>}, {pipeline_mode = #tpu.pipeline_mode<synchronous>, transform_indices = @transform_7, window_bounds = array<i64: 1, 610>}, {pipeline_mode = #tpu.pipeline_mode<synchronous>, transform_indices = @transform_8, window_bounds = array<i64: 31, 16>}, {transform_indices = @transform_9, window_bounds = array<i64: 1, 8, 128>}]} {
    %c0 = arith.constant 0 : index
    %c0_0 = arith.constant 0 : index
    %c0_1 = arith.constant 0 : index
    %0 = vector.load %arg3[%c0, %c0_0, %c0_1] : memref<9x8x4xbf16, #tpu.memory_space<vmem>>, vector<1x8x4xbf16>
    %1 = vector.shape_cast %0 : vector<1x8x4xbf16> to vector<8x4xbf16>
    %c0_2 = arith.constant 0 : index
    %c0_3 = arith.constant 0 : index
    %c0_4 = arith.constant 0 : index
    %c0_5 = arith.constant 0 : index
    %2 = vector.load %arg2[%c0_2, %c0_3, %c0_4, %c0_5] : memref<1x1x4x680xbf16, #tpu.memory_space<vmem>>, vector<1x1x4x610xbf16>
    %3 = vector.shape_cast %2 : vector<1x1x4x610xbf16> to vector<4x610xbf16>
    %cst = arith.constant dense<0.000000e+00> : vector<8x610xf32>
    %4 = tpu.matmul %1, %3, %cst {dimension_numbers = #tpu.dot_dimension_numbers<[1], [0], [0], [1], [0, 0, 1, 1], [], []>} : vector<8x4xbf16>, vector<4x610xbf16>, vector<8x610xf32> -> vector<8x610xf32>
    %c1 = arith.constant 1 : index
    %c0_6 = arith.constant 0 : index
    %c0_7 = arith.constant 0 : index
    %5 = vector.load %arg3[%c1, %c0_6, %c0_7] : memref<9x8x4xbf16, #tpu.memory_space<vmem>>, vector<1x8x4xbf16>
    %6 = vector.shape_cast %5 : vector<1x8x4xbf16> to vector<8x4xbf16>
    %c0_8 = arith.constant 0 : index
    %c0_9 = arith.constant 0 : index
    %c0_10 = arith.constant 0 : index
    %c1_11 = arith.constant 1 : index
    %7 = vector.load %arg2[%c0_8, %c0_9, %c0_10, %c1_11] : memref<1x1x4x680xbf16, #tpu.memory_space<vmem>>, vector<1x1x4x610xbf16>
    %8 = vector.shape_cast %7 : vector<1x1x4x610xbf16> to vector<4x610xbf16>
    %cst_12 = arith.constant dense<0.000000e+00> : vector<8x610xf32>
    %9 = tpu.matmul %6, %8, %cst_12 {dimension_numbers = #tpu.dot_dimension_numbers<[1], [0], [0], [1], [0, 0, 1, 1], [], []>} : vector<8x4xbf16>, vector<4x610xbf16>, vector<8x610xf32> -> vector<8x610xf32>
    %10 = arith.addf %4, %9 : vector<8x610xf32>
    %c2 = arith.constant 2 : index
    %c0_13 = arith.constant 0 : index
    %c0_14 = arith.constant 0 : index
    %11 = vector.load %arg3[%c2, %c0_13, %c0_14] : memref<9x8x4xbf16, #tpu.memory_space<vmem>>, vector<1x8x4xbf16>
    %12 = vector.shape_cast %11 : vector<1x8x4xbf16> to vector<8x4xbf16>
    %c0_15 = arith.constant 0 : index
    %c0_16 = arith.constant 0 : index
    %c0_17 = arith.constant 0 : index
    %c2_18 = arith.constant 2 : index
    %13 = vector.load %arg2[%c0_15, %c0_16, %c0_17, %c2_18] : memref<1x1x4x680xbf16, #tpu.memory_space<vmem>>, vector<1x1x4x610xbf16>
    %14 = vector.shape_cast %13 : vector<1x1x4x610xbf16> to vector<4x610xbf16>
    %cst_19 = arith.constant dense<0.000000e+00> : vector<8x610xf32>
    %15 = tpu.matmul %12, %14, %cst_19 {dimension_numbers = #tpu.dot_dimension_numbers<[1], [0], [0], [1], [0, 0, 1, 1], [], []>} : vector<8x4xbf16>, vector<4x610xbf16>, vector<8x610xf32> -> vector<8x610xf32>
    %16 = arith.addf %10, %15 : vector<8x610xf32>
    %c3 = arith.constant 3 : index
    %c0_20 = arith.constant 0 : index
    %c0_21 = arith.constant 0 : index
    %17 = vector.load %arg3[%c3, %c0_20, %c0_21] : memref<9x8x4xbf16, #tpu.memory_space<vmem>>, vector<1x8x4xbf16>
    %18 = vector.shape_cast %17 : vector<1x8x4xbf16> to vector<8x4xbf16>
    %c0_22 = arith.constant 0 : index
    %c0_23 = arith.constant 0 : index
    %c0_24 = arith.constant 0 : index
    %c34 = arith.constant 34 : index
    %19 = vector.load %arg2[%c0_22, %c0_23, %c0_24, %c34] : memref<1x1x4x680xbf16, #tpu.memory_space<vmem>>, vector<1x1x4x610xbf16>
    %20 = vector.shape_cast %19 : vector<1x1x4x610xbf16> to vector<4x610xbf16>
    %cst_25 = arith.constant dense<0.000000e+00> : vector<8x610xf32>
    %21 = tpu.matmul %18, %20, %cst_25 {dimension_numbers = #tpu.dot_dimension_numbers<[1], [0], [0], [1], [0, 0, 1, 1], [], []>} : vector<8x4xbf16>, vector<4x610xbf16>, vector<8x610xf32> -> vector<8x610xf32>
    %22 = arith.addf %16, %21 : vector<8x610xf32>
    %c4 = arith.constant 4 : index
    %c0_26 = arith.constant 0 : index
    %c0_27 = arith.constant 0 : index
    %23 = vector.load %arg3[%c4, %c0_26, %c0_27] : memref<9x8x4xbf16, #tpu.memory_space<vmem>>, vector<1x8x4xbf16>
    %24 = vector.shape_cast %23 : vector<1x8x4xbf16> to vector<8x4xbf16>
    %c0_28 = arith.constant 0 : index
    %c0_29 = arith.constant 0 : index
    %c0_30 = arith.constant 0 : index
    %c35 = arith.constant 35 : index
    %25 = vector.load %arg2[%c0_28, %c0_29, %c0_30, %c35] : memref<1x1x4x680xbf16, #tpu.memory_space<vmem>>, vector<1x1x4x610xbf16>
    %26 = vector.shape_cast %25 : vector<1x1x4x610xbf16> to vector<4x610xbf16>
    %cst_31 = arith.constant dense<0.000000e+00> : vector<8x610xf32>
    %27 = tpu.matmul %24, %26, %cst_31 {dimension_numbers = #tpu.dot_dimension_numbers<[1], [0], [0], [1], [0, 0, 1, 1], [], []>} : vector<8x4xbf16>, vector<4x610xbf16>, vector<8x610xf32> -> vector<8x610xf32>
    %28 = arith.addf %22, %27 : vector<8x610xf32>
    %c5 = arith.constant 5 : index
    %c0_32 = arith.constant 0 : index
    %c0_33 = arith.constant 0 : index
    %29 = vector.load %arg3[%c5, %c0_32, %c0_33] : memref<9x8x4xbf16, #tpu.memory_space<vmem>>, vector<1x8x4xbf16>
    %30 = vector.shape_cast %29 : vector<1x8x4xbf16> to vector<8x4xbf16>
    %c0_34 = arith.constant 0 : index
    %c0_35 = arith.constant 0 : index
    %c0_36 = arith.constant 0 : index
    %c36 = arith.constant 36 : index
    %31 = vector.load %arg2[%c0_34, %c0_35, %c0_36, %c36] : memref<1x1x4x680xbf16, #tpu.memory_space<vmem>>, vector<1x1x4x610xbf16>
    %32 = vector.shape_cast %31 : vector<1x1x4x610xbf16> to vector<4x610xbf16>
    %cst_37 = arith.constant dense<0.000000e+00> : vector<8x610xf32>
    %33 = tpu.matmul %30, %32, %cst_37 {dimension_numbers = #tpu.dot_dimension_numbers<[1], [0], [0], [1], [0, 0, 1, 1], [], []>} : vector<8x4xbf16>, vector<4x610xbf16>, vector<8x610xf32> -> vector<8x610xf32>
    %34 = arith.addf %28, %33 : vector<8x610xf32>
    %c6 = arith.constant 6 : index
    %c0_38 = arith.constant 0 : index
    %c0_39 = arith.constant 0 : index
    %35 = vector.load %arg3[%c6, %c0_38, %c0_39] : memref<9x8x4xbf16, #tpu.memory_space<vmem>>, vector<1x8x4xbf16>
    %36 = vector.shape_cast %35 : vector<1x8x4xbf16> to vector<8x4xbf16>
    %c0_40 = arith.constant 0 : index
    %c0_41 = arith.constant 0 : index
    %c0_42 = arith.constant 0 : index
    %c68 = arith.constant 68 : index
    %37 = vector.load %arg2[%c0_40, %c0_41, %c0_42, %c68] : memref<1x1x4x680xbf16, #tpu.memory_space<vmem>>, vector<1x1x4x610xbf16>
    %38 = vector.shape_cast %37 : vector<1x1x4x610xbf16> to vector<4x610xbf16>
    %cst_43 = arith.constant dense<0.000000e+00> : vector<8x610xf32>
    %39 = tpu.matmul %36, %38, %cst_43 {dimension_numbers = #tpu.dot_dimension_numbers<[1], [0], [0], [1], [0, 0, 1, 1], [], []>} : vector<8x4xbf16>, vector<4x610xbf16>, vector<8x610xf32> -> vector<8x610xf32>
    %40 = arith.addf %34, %39 : vector<8x610xf32>
    %c7 = arith.constant 7 : index
    %c0_44 = arith.constant 0 : index
    %c0_45 = arith.constant 0 : index
    %41 = vector.load %arg3[%c7, %c0_44, %c0_45] : memref<9x8x4xbf16, #tpu.memory_space<vmem>>, vector<1x8x4xbf16>
    %42 = vector.shape_cast %41 : vector<1x8x4xbf16> to vector<8x4xbf16>
    %c0_46 = arith.constant 0 : index
    %c0_47 = arith.constant 0 : index
    %c0_48 = arith.constant 0 : index
    %c69 = arith.constant 69 : index
    %43 = vector.load %arg2[%c0_46, %c0_47, %c0_48, %c69] : memref<1x1x4x680xbf16, #tpu.memory_space<vmem>>, vector<1x1x4x610xbf16>
    %44 = vector.shape_cast %43 : vector<1x1x4x610xbf16> to vector<4x610xbf16>
    %cst_49 = arith.constant dense<0.000000e+00> : vector<8x610xf32>
    %45 = tpu.matmul %42, %44, %cst_49 {dimension_numbers = #tpu.dot_dimension_numbers<[1], [0], [0], [1], [0, 0, 1, 1], [], []>} : vector<8x4xbf16>, vector<4x610xbf16>, vector<8x610xf32> -> vector<8x610xf32>
    %46 = arith.addf %40, %45 : vector<8x610xf32>
    %c8 = arith.constant 8 : index
    %c0_50 = arith.constant 0 : index
    %c0_51 = arith.constant 0 : index
    %47 = vector.load %arg3[%c8, %c0_50, %c0_51] : memref<9x8x4xbf16, #tpu.memory_space<vmem>>, vector<1x8x4xbf16>
    %48 = vector.shape_cast %47 : vector<1x8x4xbf16> to vector<8x4xbf16>
    %c0_52 = arith.constant 0 : index
    %c0_53 = arith.constant 0 : index
    %c0_54 = arith.constant 0 : index
    %c70 = arith.constant 70 : index
    %49 = vector.load %arg2[%c0_52, %c0_53, %c0_54, %c70] : memref<1x1x4x680xbf16, #tpu.memory_space<vmem>>, vector<1x1x4x610xbf16>
    %50 = vector.shape_cast %49 : vector<1x1x4x610xbf16> to vector<4x610xbf16>
    %cst_55 = arith.constant dense<0.000000e+00> : vector<8x610xf32>
    %51 = tpu.matmul %48, %50, %cst_55 {dimension_numbers = #tpu.dot_dimension_numbers<[1], [0], [0], [1], [0, 0, 1, 1], [], []>} : vector<8x4xbf16>, vector<4x610xbf16>, vector<8x610xf32> -> vector<8x610xf32>
    %52 = arith.addf %46, %51 : vector<8x610xf32>
    %c0_56 = arith.constant 0 : index
    %c0_57 = arith.constant 0 : index
    %53 = vector.load %arg4[%c0_56, %c0_57] : memref<8x1xf32, #tpu.memory_space<vmem>>, vector<8x1xf32>
    %54 = vector.broadcast %53 : vector<8x1xf32> to vector<8x610xf32>
    %55 = arith.mulf %52, %54 : vector<8x610xf32>
    %c0_58 = arith.constant 0 : index
    %c0_59 = arith.constant 0 : index
    %56 = vector.load %arg5[%c0_58, %c0_59] : memref<8x1xf32, #tpu.memory_space<vmem>>, vector<8x1xf32>
    %57 = vector.broadcast %56 : vector<8x1xf32> to vector<8x610xf32>
    %58 = arith.addf %55, %57 : vector<8x610xf32>
    %cst_60 = arith.constant 0.000000e+00 : f32
    %59 = vector.broadcast %cst_60 : f32 to vector<8x610xf32>
    %60 = arith.cmpf ogt, %58, %59 : vector<8x610xf32>
    %cst_61 = arith.constant 0.00999999977 : f32
    %61 = vector.broadcast %cst_61 : f32 to vector<8x610xf32>
    %62 = arith.mulf %61, %58 : vector<8x610xf32>
    %63 = arith.select %60, %58, %62 : vector<8x610xi1>, vector<8x610xf32>
    %c0_62 = arith.constant 0 : index
    %c0_63 = arith.constant 0 : index
    %64 = vector.load %arg9[%c0_62, %c0_63] : memref<1x610xf32, #tpu.memory_space<vmem>>, vector<1x610xf32>
    %65 = vector.broadcast %64 : vector<1x610xf32> to vector<8x610xf32>
    %66 = arith.mulf %63, %65 : vector<8x610xf32>
    %67 = arith.truncf %66 : vector<8x610xf32> to vector<8x610xbf16>
    %c0_64 = arith.constant 0 : index
    %c1_65 = arith.constant 1 : index
    %68 = vector.load %arg12[%c0_64, %c1_65] : memref<8x612xbf16, #tpu.memory_space<vmem>>, vector<8x610xbf16>
    tpu.vector_store %arg12[%c0_64, %c1_65], %67 {strides = array<i32>} : memref<8x612xbf16, #tpu.memory_space<vmem>>, vector<8x610xbf16>,
    %cst_66 = arith.constant 0.000000e+00 : bf16
    %69 = vector.broadcast %cst_66 : bf16 to vector<8x1xbf16>
    %c0_67 = arith.constant 0 : index
    %c0_68 = arith.constant 0 : index
    %70 = vector.load %arg12[%c0_67, %c0_68] : memref<8x612xbf16, #tpu.memory_space<vmem>>, vector<8x1xbf16>
    tpu.vector_store %arg12[%c0_67, %c0_68], %69 {strides = array<i32>} : memref<8x612xbf16, #tpu.memory_space<vmem>>, vector<8x1xbf16>,
    %c0_69 = arith.constant 0 : index
    %c611 = arith.constant 611 : index
    %71 = vector.load %arg12[%c0_69, %c611] : memref<8x612xbf16, #tpu.memory_space<vmem>>, vector<8x1xbf16>
    tpu.vector_store %arg12[%c0_69, %c611], %69 {strides = array<i32>} : memref<8x612xbf16, #tpu.memory_space<vmem>>, vector<8x1xbf16>,
    %c0_i32 = arith.constant 0 : i32
    %72 = arith.cmpi eq, %arg1, %c0_i32 : i32
    %73 = arith.extui %72 : i1 to i32
    %c0_i32_70 = arith.constant 0 : i32
    %74 = arith.cmpi ne, %73, %c0_i32_70 : i32
    scf.if %74 {
      %cst_152 = arith.constant 0.000000e+00 : bf16
      %182 = vector.broadcast %cst_152 : bf16 to vector<8x34xbf16>
      %c0_153 = arith.constant 0 : index
      %c0_154 = arith.constant 0 : index
      %183 = vector.load %arg12[%c0_153, %c0_154] : memref<8x612xbf16, #tpu.memory_space<vmem>>, vector<8x34xbf16>
      tpu.vector_store %arg12[%c0_153, %c0_154], %182 {strides = array<i32>} : memref<8x612xbf16, #tpu.memory_space<vmem>>, vector<8x34xbf16>,
    } else {
    }
    %c1_i32 = arith.constant 1 : i32
    %75 = arith.cmpi eq, %arg1, %c1_i32 : i32
    %76 = arith.extui %75 : i1 to i32
    %c0_i32_71 = arith.constant 0 : i32
    %77 = arith.cmpi ne, %76, %c0_i32_71 : i32
    scf.if %77 {
      %cst_152 = arith.constant 0.000000e+00 : bf16
      %182 = vector.broadcast %cst_152 : bf16 to vector<8x34xbf16>
      %c0_153 = arith.constant 0 : index
      %c578 = arith.constant 578 : index
      %183 = vector.load %arg12[%c0_153, %c578] : memref<8x612xbf16, #tpu.memory_space<vmem>>, vector<8x34xbf16>
      tpu.vector_store %arg12[%c0_153, %c578], %182 {strides = array<i32>} : memref<8x612xbf16, #tpu.memory_space<vmem>>, vector<8x34xbf16>,
    } else {
    }
    %c0_72 = arith.constant 0 : index
    %c0_73 = arith.constant 0 : index
    %c0_74 = arith.constant 0 : index
    %78 = vector.load %arg6[%c0_72, %c0_73, %c0_74] : memref<9x8x8xbf16, #tpu.memory_space<vmem>>, vector<1x8x8xbf16>
    %79 = vector.shape_cast %78 : vector<1x8x8xbf16> to vector<8x8xbf16>
    %c0_75 = arith.constant 0 : index
    %c0_76 = arith.constant 0 : index
    %80 = vector.load %arg12[%c0_75, %c0_76] : memref<8x612xbf16, #tpu.memory_space<vmem>>, vector<8x542xbf16>
    %cst_77 = arith.constant dense<0.000000e+00> : vector<8x542xf32>
    %81 = tpu.matmul %79, %80, %cst_77 {dimension_numbers = #tpu.dot_dimension_numbers<[1], [0], [0], [1], [0, 0, 1, 1], [], []>} : vector<8x8xbf16>, vector<8x542xbf16>, vector<8x542xf32> -> vector<8x542xf32>
    %c1_78 = arith.constant 1 : index
    %c0_79 = arith.constant 0 : index
    %c0_80 = arith.constant 0 : index
    %82 = vector.load %arg6[%c1_78, %c0_79, %c0_80] : memref<9x8x8xbf16, #tpu.memory_space<vmem>>, vector<1x8x8xbf16>
    %83 = vector.shape_cast %82 : vector<1x8x8xbf16> to vector<8x8xbf16>
    %c0_81 = arith.constant 0 : index
    %c1_82 = arith.constant 1 : index
    %84 = vector.load %arg12[%c0_81, %c1_82] : memref<8x612xbf16, #tpu.memory_space<vmem>>, vector<8x542xbf16>
    %cst_83 = arith.constant dense<0.000000e+00> : vector<8x542xf32>
    %85 = tpu.matmul %83, %84, %cst_83 {dimension_numbers = #tpu.dot_dimension_numbers<[1], [0], [0], [1], [0, 0, 1, 1], [], []>} : vector<8x8xbf16>, vector<8x542xbf16>, vector<8x542xf32> -> vector<8x542xf32>
    %86 = arith.addf %81, %85 : vector<8x542xf32>
    %c2_84 = arith.constant 2 : index
    %c0_85 = arith.constant 0 : index
    %c0_86 = arith.constant 0 : index
    %87 = vector.load %arg6[%c2_84, %c0_85, %c0_86] : memref<9x8x8xbf16, #tpu.memory_space<vmem>>, vector<1x8x8xbf16>
    %88 = vector.shape_cast %87 : vector<1x8x8xbf16> to vector<8x8xbf16>
    %c0_87 = arith.constant 0 : index
    %c2_88 = arith.constant 2 : index
    %89 = vector.load %arg12[%c0_87, %c2_88] : memref<8x612xbf16, #tpu.memory_space<vmem>>, vector<8x542xbf16>
    %cst_89 = arith.constant dense<0.000000e+00> : vector<8x542xf32>
    %90 = tpu.matmul %88, %89, %cst_89 {dimension_numbers = #tpu.dot_dimension_numbers<[1], [0], [0], [1], [0, 0, 1, 1], [], []>} : vector<8x8xbf16>, vector<8x542xbf16>, vector<8x542xf32> -> vector<8x542xf32>
    %91 = arith.addf %86, %90 : vector<8x542xf32>
    %c3_90 = arith.constant 3 : index
    %c0_91 = arith.constant 0 : index
    %c0_92 = arith.constant 0 : index
    %92 = vector.load %arg6[%c3_90, %c0_91, %c0_92] : memref<9x8x8xbf16, #tpu.memory_space<vmem>>, vector<1x8x8xbf16>
    %93 = vector.shape_cast %92 : vector<1x8x8xbf16> to vector<8x8xbf16>
    %c0_93 = arith.constant 0 : index
    %c34_94 = arith.constant 34 : index
    %94 = vector.load %arg12[%c0_93, %c34_94] : memref<8x612xbf16, #tpu.memory_space<vmem>>, vector<8x542xbf16>
    %cst_95 = arith.constant dense<0.000000e+00> : vector<8x542xf32>
    %95 = tpu.matmul %93, %94, %cst_95 {dimension_numbers = #tpu.dot_dimension_numbers<[1], [0], [0], [1], [0, 0, 1, 1], [], []>} : vector<8x8xbf16>, vector<8x542xbf16>, vector<8x542xf32> -> vector<8x542xf32>
    %96 = arith.addf %91, %95 : vector<8x542xf32>
    %c4_96 = arith.constant 4 : index
    %c0_97 = arith.constant 0 : index
    %c0_98 = arith.constant 0 : index
    %97 = vector.load %arg6[%c4_96, %c0_97, %c0_98] : memref<9x8x8xbf16, #tpu.memory_space<vmem>>, vector<1x8x8xbf16>
    %98 = vector.shape_cast %97 : vector<1x8x8xbf16> to vector<8x8xbf16>
    %c0_99 = arith.constant 0 : index
    %c35_100 = arith.constant 35 : index
    %99 = vector.load %arg12[%c0_99, %c35_100] : memref<8x612xbf16, #tpu.memory_space<vmem>>, vector<8x542xbf16>
    %cst_101 = arith.constant dense<0.000000e+00> : vector<8x542xf32>
    %100 = tpu.matmul %98, %99, %cst_101 {dimension_numbers = #tpu.dot_dimension_numbers<[1], [0], [0], [1], [0, 0, 1, 1], [], []>} : vector<8x8xbf16>, vector<8x542xbf16>, vector<8x542xf32> -> vector<8x542xf32>
    %101 = arith.addf %96, %100 : vector<8x542xf32>
    %c5_102 = arith.constant 5 : index
    %c0_103 = arith.constant 0 : index
    %c0_104 = arith.constant 0 : index
    %102 = vector.load %arg6[%c5_102, %c0_103, %c0_104] : memref<9x8x8xbf16, #tpu.memory_space<vmem>>, vector<1x8x8xbf16>
    %103 = vector.shape_cast %102 : vector<1x8x8xbf16> to vector<8x8xbf16>
    %c0_105 = arith.constant 0 : index
    %c36_106 = arith.constant 36 : index
    %104 = vector.load %arg12[%c0_105, %c36_106] : memref<8x612xbf16, #tpu.memory_space<vmem>>, vector<8x542xbf16>
    %cst_107 = arith.constant dense<0.000000e+00> : vector<8x542xf32>
    %105 = tpu.matmul %103, %104, %cst_107 {dimension_numbers = #tpu.dot_dimension_numbers<[1], [0], [0], [1], [0, 0, 1, 1], [], []>} : vector<8x8xbf16>, vector<8x542xbf16>, vector<8x542xf32> -> vector<8x542xf32>
    %106 = arith.addf %101, %105 : vector<8x542xf32>
    %c6_108 = arith.constant 6 : index
    %c0_109 = arith.constant 0 : index
    %c0_110 = arith.constant 0 : index
    %107 = vector.load %arg6[%c6_108, %c0_109, %c0_110] : memref<9x8x8xbf16, #tpu.memory_space<vmem>>, vector<1x8x8xbf16>
    %108 = vector.shape_cast %107 : vector<1x8x8xbf16> to vector<8x8xbf16>
    %c0_111 = arith.constant 0 : index
    %c68_112 = arith.constant 68 : index
    %109 = vector.load %arg12[%c0_111, %c68_112] : memref<8x612xbf16, #tpu.memory_space<vmem>>, vector<8x542xbf16>
    %cst_113 = arith.constant dense<0.000000e+00> : vector<8x542xf32>
    %110 = tpu.matmul %108, %109, %cst_113 {dimension_numbers = #tpu.dot_dimension_numbers<[1], [0], [0], [1], [0, 0, 1, 1], [], []>} : vector<8x8xbf16>, vector<8x542xbf16>, vector<8x542xf32> -> vector<8x542xf32>
    %111 = arith.addf %106, %110 : vector<8x542xf32>
    %c7_114 = arith.constant 7 : index
    %c0_115 = arith.constant 0 : index
    %c0_116 = arith.constant 0 : index
    %112 = vector.load %arg6[%c7_114, %c0_115, %c0_116] : memref<9x8x8xbf16, #tpu.memory_space<vmem>>, vector<1x8x8xbf16>
    %113 = vector.shape_cast %112 : vector<1x8x8xbf16> to vector<8x8xbf16>
    %c0_117 = arith.constant 0 : index
    %c69_118 = arith.constant 69 : index
    %114 = vector.load %arg12[%c0_117, %c69_118] : memref<8x612xbf16, #tpu.memory_space<vmem>>, vector<8x542xbf16>
    %cst_119 = arith.constant dense<0.000000e+00> : vector<8x542xf32>
    %115 = tpu.matmul %113, %114, %cst_119 {dimension_numbers = #tpu.dot_dimension_numbers<[1], [0], [0], [1], [0, 0, 1, 1], [], []>} : vector<8x8xbf16>, vector<8x542xbf16>, vector<8x542xf32> -> vector<8x542xf32>
    %116 = arith.addf %111, %115 : vector<8x542xf32>
    %c8_120 = arith.constant 8 : index
    %c0_121 = arith.constant 0 : index
    %c0_122 = arith.constant 0 : index
    %117 = vector.load %arg6[%c8_120, %c0_121, %c0_122] : memref<9x8x8xbf16, #tpu.memory_space<vmem>>, vector<1x8x8xbf16>
    %118 = vector.shape_cast %117 : vector<1x8x8xbf16> to vector<8x8xbf16>
    %c0_123 = arith.constant 0 : index
    %c70_124 = arith.constant 70 : index
    %119 = vector.load %arg12[%c0_123, %c70_124] : memref<8x612xbf16, #tpu.memory_space<vmem>>, vector<8x542xbf16>
    %cst_125 = arith.constant dense<0.000000e+00> : vector<8x542xf32>
    %120 = tpu.matmul %118, %119, %cst_125 {dimension_numbers = #tpu.dot_dimension_numbers<[1], [0], [0], [1], [0, 0, 1, 1], [], []>} : vector<8x8xbf16>, vector<8x542xbf16>, vector<8x542xf32> -> vector<8x542xf32>
    %121 = arith.addf %116, %120 : vector<8x542xf32>
    %c0_126 = arith.constant 0 : index
    %c0_127 = arith.constant 0 : index
    %122 = vector.load %arg7[%c0_126, %c0_127] : memref<8x1xf32, #tpu.memory_space<vmem>>, vector<8x1xf32>
    %123 = vector.broadcast %122 : vector<8x1xf32> to vector<8x542xf32>
    %124 = arith.mulf %121, %123 : vector<8x542xf32>
    %c0_128 = arith.constant 0 : index
    %c0_129 = arith.constant 0 : index
    %125 = vector.load %arg8[%c0_128, %c0_129] : memref<8x1xf32, #tpu.memory_space<vmem>>, vector<8x1xf32>
    %126 = vector.broadcast %125 : vector<8x1xf32> to vector<8x542xf32>
    %127 = arith.addf %124, %126 : vector<8x542xf32>
    %cst_130 = arith.constant 0.000000e+00 : f32
    %128 = vector.broadcast %cst_130 : f32 to vector<8x542xf32>
    %129 = arith.cmpf ogt, %127, %128 : vector<8x542xf32>
    %cst_131 = arith.constant 0.00999999977 : f32
    %130 = vector.broadcast %cst_131 : f32 to vector<8x542xf32>
    %131 = arith.mulf %130, %127 : vector<8x542xf32>
    %132 = arith.select %129, %127, %131 : vector<8x542xi1>, vector<8x542xf32>
    %133 = vector.extract_strided_slice %132 {offsets = [0, 0], sizes = [8, 508], strides = [1, 1]} : vector<8x542xf32> to vector<8x508xf32>
    %134 = vector.extract_strided_slice %132 {offsets = [0, 34], sizes = [8, 508], strides = [1, 1]} : vector<8x542xf32> to vector<8x508xf32>
    %135 = arith.maximumf %133, %134 : vector<8x508xf32>
    %136 = vector.extract_strided_slice %135 {offsets = [0, 0], sizes = [8, 507], strides = [1, 1]} : vector<8x508xf32> to vector<8x507xf32>
    %137 = vector.extract_strided_slice %135 {offsets = [0, 1], sizes = [8, 507], strides = [1, 1]} : vector<8x508xf32> to vector<8x507xf32>
    %138 = arith.maximumf %136, %137 : vector<8x507xf32>
    %139 = vector.extract_strided_slice %138 {offsets = [0, 0], sizes = [8, 31], strides = [1, 1]} : vector<8x507xf32> to vector<8x31xf32>
    %140 = vector.extract_strided_slice %138 {offsets = [0, 68], sizes = [8, 31], strides = [1, 1]} : vector<8x507xf32> to vector<8x31xf32>
    %141 = vector.extract_strided_slice %138 {offsets = [0, 136], sizes = [8, 31], strides = [1, 1]} : vector<8x507xf32> to vector<8x31xf32>
    %142 = vector.extract_strided_slice %138 {offsets = [0, 204], sizes = [8, 31], strides = [1, 1]} : vector<8x507xf32> to vector<8x31xf32>
    %143 = vector.extract_strided_slice %138 {offsets = [0, 272], sizes = [8, 31], strides = [1, 1]} : vector<8x507xf32> to vector<8x31xf32>
    %144 = vector.extract_strided_slice %138 {offsets = [0, 340], sizes = [8, 31], strides = [1, 1]} : vector<8x507xf32> to vector<8x31xf32>
    %145 = vector.extract_strided_slice %138 {offsets = [0, 408], sizes = [8, 31], strides = [1, 1]} : vector<8x507xf32> to vector<8x31xf32>
    %146 = vector.extract_strided_slice %138 {offsets = [0, 476], sizes = [8, 31], strides = [1, 1]} : vector<8x507xf32> to vector<8x31xf32>
    %147 = tpu.concatenate %139, %140, %141, %142, %143, %144, %145, %146 in 0 : vector<8x31xf32>, vector<8x31xf32>, vector<8x31xf32>, vector<8x31xf32>, vector<8x31xf32>, vector<8x31xf32>, vector<8x31xf32>, vector<8x31xf32> -> vector<64x31xf32>
    %c0_132 = arith.constant 0 : index
    %c0_133 = arith.constant 0 : index
    %148 = vector.load %arg10[%c0_132, %c0_133] : memref<31x16xf32, #tpu.memory_space<vmem>>, vector<31x16xf32>
    %cst_134 = arith.constant dense<0.000000e+00> : vector<64x16xf32>
    %149 = tpu.matmul %147, %148, %cst_134 {dimension_numbers = #tpu.dot_dimension_numbers<[1], [0], [0], [1], [0, 0, 1, 1], [], []>} : vector<64x31xf32>, vector<31x16xf32>, vector<64x16xf32> -> vector<64x16xf32>
    %150 = vector.extract_strided_slice %149 {offsets = [0, 0], sizes = [8, 16], strides = [1, 1]} : vector<64x16xf32> to vector<8x16xf32>
    %c0_135 = arith.constant 0 : index
    %c0_136 = arith.constant 0 : index
    %c0_137 = arith.constant 0 : index
    %151 = vector.load %arg11[%c0_135, %c0_136, %c0_137] : memref<1x8x128xf32, #tpu.memory_space<vmem>>, vector<1x8x16xf32>
    %152 = vector.shape_cast %151 : vector<1x8x16xf32> to vector<8x16xf32>
    %153 = vector.shape_cast %150 : vector<8x16xf32> to vector<1x8x16xf32>
    tpu.vector_store %arg11[%c0_135, %c0_136, %c0_137], %153 {strides = array<i32>} : memref<1x8x128xf32, #tpu.memory_space<vmem>>, vector<1x8x16xf32>,
    %154 = vector.extract_strided_slice %149 {offsets = [8, 0], sizes = [8, 16], strides = [1, 1]} : vector<64x16xf32> to vector<8x16xf32>
    %c0_138 = arith.constant 0 : index
    %c0_139 = arith.constant 0 : index
    %c16 = arith.constant 16 : index
    %155 = vector.load %arg11[%c0_138, %c0_139, %c16] : memref<1x8x128xf32, #tpu.memory_space<vmem>>, vector<1x8x16xf32>
    %156 = vector.shape_cast %155 : vector<1x8x16xf32> to vector<8x16xf32>
    %157 = vector.shape_cast %154 : vector<8x16xf32> to vector<1x8x16xf32>
    tpu.vector_store %arg11[%c0_138, %c0_139, %c16], %157 {strides = array<i32>} : memref<1x8x128xf32, #tpu.memory_space<vmem>>, vector<1x8x16xf32>,
    %158 = vector.extract_strided_slice %149 {offsets = [16, 0], sizes = [8, 16], strides = [1, 1]} : vector<64x16xf32> to vector<8x16xf32>
    %c0_140 = arith.constant 0 : index
    %c0_141 = arith.constant 0 : index
    %c32 = arith.constant 32 : index
    %159 = vector.load %arg11[%c0_140, %c0_141, %c32] : memref<1x8x128xf32, #tpu.memory_space<vmem>>, vector<1x8x16xf32>
    %160 = vector.shape_cast %159 : vector<1x8x16xf32> to vector<8x16xf32>
    %161 = vector.shape_cast %158 : vector<8x16xf32> to vector<1x8x16xf32>
    tpu.vector_store %arg11[%c0_140, %c0_141, %c32], %161 {strides = array<i32>} : memref<1x8x128xf32, #tpu.memory_space<vmem>>, vector<1x8x16xf32>,
    %162 = vector.extract_strided_slice %149 {offsets = [24, 0], sizes = [8, 16], strides = [1, 1]} : vector<64x16xf32> to vector<8x16xf32>
    %c0_142 = arith.constant 0 : index
    %c0_143 = arith.constant 0 : index
    %c48 = arith.constant 48 : index
    %163 = vector.load %arg11[%c0_142, %c0_143, %c48] : memref<1x8x128xf32, #tpu.memory_space<vmem>>, vector<1x8x16xf32>
    %164 = vector.shape_cast %163 : vector<1x8x16xf32> to vector<8x16xf32>
    %165 = vector.shape_cast %162 : vector<8x16xf32> to vector<1x8x16xf32>
    tpu.vector_store %arg11[%c0_142, %c0_143, %c48], %165 {strides = array<i32>} : memref<1x8x128xf32, #tpu.memory_space<vmem>>, vector<1x8x16xf32>,
    %166 = vector.extract_strided_slice %149 {offsets = [32, 0], sizes = [8, 16], strides = [1, 1]} : vector<64x16xf32> to vector<8x16xf32>
    %c0_144 = arith.constant 0 : index
    %c0_145 = arith.constant 0 : index
    %c64 = arith.constant 64 : index
    %167 = vector.load %arg11[%c0_144, %c0_145, %c64] : memref<1x8x128xf32, #tpu.memory_space<vmem>>, vector<1x8x16xf32>
    %168 = vector.shape_cast %167 : vector<1x8x16xf32> to vector<8x16xf32>
    %169 = vector.shape_cast %166 : vector<8x16xf32> to vector<1x8x16xf32>
    tpu.vector_store %arg11[%c0_144, %c0_145, %c64], %169 {strides = array<i32>} : memref<1x8x128xf32, #tpu.memory_space<vmem>>, vector<1x8x16xf32>,
    %170 = vector.extract_strided_slice %149 {offsets = [40, 0], sizes = [8, 16], strides = [1, 1]} : vector<64x16xf32> to vector<8x16xf32>
    %c0_146 = arith.constant 0 : index
    %c0_147 = arith.constant 0 : index
    %c80 = arith.constant 80 : index
    %171 = vector.load %arg11[%c0_146, %c0_147, %c80] : memref<1x8x128xf32, #tpu.memory_space<vmem>>, vector<1x8x16xf32>
    %172 = vector.shape_cast %171 : vector<1x8x16xf32> to vector<8x16xf32>
    %173 = vector.shape_cast %170 : vector<8x16xf32> to vector<1x8x16xf32>
    tpu.vector_store %arg11[%c0_146, %c0_147, %c80], %173 {strides = array<i32>} : memref<1x8x128xf32, #tpu.memory_space<vmem>>, vector<1x8x16xf32>,
    %174 = vector.extract_strided_slice %149 {offsets = [48, 0], sizes = [8, 16], strides = [1, 1]} : vector<64x16xf32> to vector<8x16xf32>
    %c0_148 = arith.constant 0 : index
    %c0_149 = arith.constant 0 : index
    %c96 = arith.constant 96 : index
    %175 = vector.load %arg11[%c0_148, %c0_149, %c96] : memref<1x8x128xf32, #tpu.memory_space<vmem>>, vector<1x8x16xf32>
    %176 = vector.shape_cast %175 : vector<1x8x16xf32> to vector<8x16xf32>
    %177 = vector.shape_cast %174 : vector<8x16xf32> to vector<1x8x16xf32>
    tpu.vector_store %arg11[%c0_148, %c0_149, %c96], %177 {strides = array<i32>} : memref<1x8x128xf32, #tpu.memory_space<vmem>>, vector<1x8x16xf32>,
    %178 = vector.extract_strided_slice %149 {offsets = [56, 0], sizes = [8, 16], strides = [1, 1]} : vector<64x16xf32> to vector<8x16xf32>
    %c0_150 = arith.constant 0 : index
    %c0_151 = arith.constant 0 : index
    %c112 = arith.constant 112 : index
    %179 = vector.load %arg11[%c0_150, %c0_151, %c112] : memref<1x8x128xf32, #tpu.memory_space<vmem>>, vector<1x8x16xf32>
    %180 = vector.shape_cast %179 : vector<1x8x16xf32> to vector<8x16xf32>
    %181 = vector.shape_cast %178 : vector<8x16xf32> to vector<1x8x16xf32>
    tpu.vector_store %arg11[%c0_150, %c0_151, %c112], %181 {strides = array<i32>} : memref<1x8x128xf32, #tpu.memory_space<vmem>>, vector<1x8x16xf32>,
    return
  }
  func.func @transform_0(%arg0: i32, %arg1: i32) -> (i32, i32, i32, i32) {
    %c0_i32 = arith.constant 0 : i32
    %c0_i32_0 = arith.constant 0 : i32
    %c0_i32_1 = arith.constant 0 : i32
    return %arg0, %arg1, %c0_i32, %c0_i32_0 : i32, i32, i32, i32
  }
  func.func @transform_1(%arg0: i32, %arg1: i32) -> (i32, i32, i32) {
    %c0_i32 = arith.constant 0 : i32
    %c0_i32_0 = arith.constant 0 : i32
    %c0_i32_1 = arith.constant 0 : i32
    %c0_i32_2 = arith.constant 0 : i32
    return %c0_i32, %c0_i32_0, %c0_i32_1 : i32, i32, i32
  }
  func.func @transform_2(%arg0: i32, %arg1: i32) -> (i32, i32) {
    %c0_i32 = arith.constant 0 : i32
    %c0_i32_0 = arith.constant 0 : i32
    %c0_i32_1 = arith.constant 0 : i32
    return %c0_i32, %c0_i32_0 : i32, i32
  }
  func.func @transform_3(%arg0: i32, %arg1: i32) -> (i32, i32) {
    %c0_i32 = arith.constant 0 : i32
    %c0_i32_0 = arith.constant 0 : i32
    %c0_i32_1 = arith.constant 0 : i32
    return %c0_i32, %c0_i32_0 : i32, i32
  }
  func.func @transform_4(%arg0: i32, %arg1: i32) -> (i32, i32, i32) {
    %c0_i32 = arith.constant 0 : i32
    %c0_i32_0 = arith.constant 0 : i32
    %c0_i32_1 = arith.constant 0 : i32
    %c0_i32_2 = arith.constant 0 : i32
    return %c0_i32, %c0_i32_0, %c0_i32_1 : i32, i32, i32
  }
  func.func @transform_5(%arg0: i32, %arg1: i32) -> (i32, i32) {
    %c0_i32 = arith.constant 0 : i32
    %c0_i32_0 = arith.constant 0 : i32
    %c0_i32_1 = arith.constant 0 : i32
    return %c0_i32, %c0_i32_0 : i32, i32
  }
  func.func @transform_6(%arg0: i32, %arg1: i32) -> (i32, i32) {
    %c0_i32 = arith.constant 0 : i32
    %c0_i32_0 = arith.constant 0 : i32
    %c0_i32_1 = arith.constant 0 : i32
    return %c0_i32, %c0_i32_0 : i32, i32
  }
  func.func @transform_7(%arg0: i32, %arg1: i32) -> (i32, i32) {
    %c0_i32 = arith.constant 0 : i32
    %c0_i32_0 = arith.constant 0 : i32
    %c0_i32_1 = arith.constant 0 : i32
    return %c0_i32, %c0_i32_0 : i32, i32
  }
  func.func @transform_8(%arg0: i32, %arg1: i32) -> (i32, i32) {
    %c0_i32 = arith.constant 0 : i32
    %c0_i32_0 = arith.constant 0 : i32
    %c0_i32_1 = arith.constant 0 : i32
    return %c0_i32, %c0_i32_0 : i32, i32
  }
  func.func @transform_9(%arg0: i32, %arg1: i32) -> (i32, i32, i32) {
    %c0_i32 = arith.constant 0 : i32
    %c0_i32_0 = arith.constant 0 : i32
    return %arg0, %c0_i32, %arg1 : i32, i32, i32
  }
}

</mosaic_0001>

<bundles_post_ra>
// kernel: tpu_custom_call.1
= control target key start
LH: loop header
LB: loop body
LE: loop exit
PB: predicated region body
PF: predicated region fallthrough
CT: control target
= control target key end

     0   :  { %14 = vsyncpa [#allocation4], 0  ;;  %s5694_s0 = inlined_call_operand.vmem [shape: bf16[2,2,4,680], index: 0, kind: input, shape index: {}]   ;;  %s5695_s1 = inlined_call_operand.vmem [shape: bf16[9,8,4], index: 1, kind: input, shape index: {}]   ;;  %s5696_s2 = inlined_call_operand.vmem [shape: f32[8,1], index: 2, kind: input, shape index: {}]   ;;  %s5697_s3 = inlined_call_operand.vmem [shape: f32[8,1], index: 3, kind: input, shape index: {}]   ;;  %s5698_s4 = inlined_call_operand.vmem [shape: bf16[9,8,8], index: 4, kind: input, shape index: {}]   ;;  %s5699_s5 = inlined_call_operand.vmem [shape: f32[8,1], index: 5, kind: input, shape index: {}]   ;;  %s5700_s6 = inlined_call_operand.vmem [shape: f32[8,1], index: 6, kind: input, shape index: {}]   ;;  %s5701_s7 = inlined_call_operand.vmem [shape: f32[1,610], index: 7, kind: input, shape index: {}]   ;;  %s5702_s8 = inlined_call_operand.vmem [shape: f32[31,16], index: 8, kind: input, shape index: {}]   ;;  %s5703_s9 = inlined_call_operand.hbm [shape: f32[2,8,256], index: 9, kind: output, shape index: {}]  }
   0x1   :  { %16 = vsyncpa [#allocation4 + $0x1], 0  ;;  %s4799_s30 = smov 0   ;;  %s4801_s10 = smov 0  }
   0x2   :  { %s4803_s11 = smov 0   ;;  %s4805_s12 = smov 0  }
   0x3   :  { %s4807_s13 = smov 0   ;;  %s4809_s14 = smov 0  }
   0x4   :  { %s4811_s15 = smov 0   ;;  %s4813_s16 = smov 0  }
   0x5 LB: > { %5717 = sst [smem:[#allocation6_spill]] %s4714_s15  ;;  %s3989_s17 = sadd.s32 4294967295, %s4718_s16   ;;  %s4718_s16 = sphi %s4813_s16, %s22_s16   ;;  %s4714_s15 = sphi %s4811_s15, %s5733_s15   ;;  %s4710_s14 = sphi %s4809_s14, %s5738_s14   ;;  %s4706_s13 = sphi %s4807_s13, %s5731_s13   ;;  %s4702_s12 = sphi %s4805_s12, %s5737_s12   ;;  %s4698_s11 = sphi %s4803_s11, %s5736_s11   ;;  %s4694_s10 = sphi %s4801_s10, %s5735_s10   ;;  %s4690_s30 = sphi %s4799_s30, %s5734_s30  }
   0x6   : > { %s3990_s18 = sadd.s32 4294967294, %s4718_s16   ;;  %s31_s19 = sadd.s32 1, %s4710_s14 }
   0x7   : > { %p32_p0 = scmp.ge.s32.totalorder %s31_s19, 2  ;;  %s34_s20 = sadd.s32 1, %s4714_s15 }
   0x8   : > { %p249_p1 = scmp.ne.s32.totalorder %s4698_s11, %s4694_s10  ;;  %p250_p2 = scmp.eq.s32.totalorder %s3989_s17, 3 }
   0x9   : > { %s5740_s19 = smov (%p32_p0, %s31_s19), 0  ;;  %s5742_s20 = smov (!%p32_p0, %s34_s20), %s4714_s15 }
   0xa   : > { %5718 = sst [smem:[#allocation7_spill]] %s5740_s19  ;;  %s235_s21 = ssub.s32 %s4710_s14, %s5740_s19 }
   0xb   : > { %p4850_p3 = por %p250_p2, %p249_p1  ;;  %p36_p4 = scmp.ge.s32.totalorder %s5742_s20, 2 }
   0xc   : > { %p255_p5 = scmp.ne.s32.totalorder %s4694_s10, %s4690_s30  ;;  %p256_p6 = scmp.eq.s32.totalorder %s3990_s18, 3 }
   0xd   : > { %p3993_p7 = scmp.ge.s32.totalorder %s4718_s16, 1  ;;  %s5744_s20 = smov (%p36_p4, %s5742_s20), 0 }
   0xe   : > { %5720 = sst [smem:[#allocation8_spill]] %s5744_s20  ;;  %p4859_p8 = por %p256_p6, %p255_p5 }
   0xf   : > { %p310_p9 = scmp.lt.s32.totalorder %s4718_s16, 5  ;;  %s234_s24 = ssub.s32 %s4714_s15, %s5744_s20 }
  0x10   : > { %s239_s25 = sadd.s32 1, %s4698_s11  ;;  %s236_s26 = sor.u32 %s235_s21, %s234_s24 }
  0x11   : > { %p311_p10 = pnand %p3993_p7, %p310_p9  ;;  %p237_p11 = scmp.eq.s32.totalorder %s236_s26, 0 }
  0x12   : > { %p350_p12 = scmp.lt.s32.totalorder (!%p311_p10), %s4706_s13, 1  ;;  %p352_p13 = scmp.lt.s32.totalorder (!%p311_p10), %s4702_s12, 1  ;;  %v371_v0 = vlaneseq (!%p311_p10)  ;;  %v4720_v1 = vmov (!%p311_p10), 1983009808   ;;  %v4721_v6 = vmov (!%p311_p10), 0   ;;  %vm401_vm0 = vcmask (!%p311_p10), 1039360  }
  0x13   : > { %s4868_s27 = scalar_select %p237_p11, %s4698_s11, %s239_s25  }
  0x14   : > { %314 = sbr.rel (%p311_p10) target bundleno = 1965 (0x7ad), region = 56  ;;  %v369_v2 = vunpack.c.l.s4 (!%p311_p10), %v4720_v1  ;;  %v4874_v4 = vshrl.u32 (!%p311_p10), %v371_v0, 7  ;;  %s5707_s21 = sand.u32 (!%p311_p10), 1, %s4694_s10   ;;  %458 = vmatprep.mubr.bf16.mxu0 (!%p311_p10), %v4721_v6  ;;  %1988 = vmatprep.mubr.bf16.mxu1 (!%p311_p10), %v4721_v6  ;;  %vm410_vm1 = vcmask (!%p311_p10), 1041408   ;;  %v3996_v24 = vld [vmem:[%s5695_s1 + $0x4] sm:$0xf] (!%p311_p10) }
  0x15   : > { %s4880_s25 = sshll.u32 (!%p311_p10), %s5707_s21, 3  ;;  %4614 = vset.pattern.permute.xlu0 (!%p311_p10), %v4721_v6  ;;  %4615 = vset.pattern.permute.xlu1 (!%p311_p10), %v4721_v6  ;;  %s4723_s19 = smov (!%p311_p10), 126   ;;  %vm406_vm2 = vcmask (!%p311_p10), 31744   ;;  %v4730_v29 = vmov (!%p311_p10), 0.0   ;;  %vm4731_vm3 = vmmov (!%p311_p10), 0   ;;  %vm728_vm4 = vcmask (!%p311_p10), 1031168  }
  0x16   : > { %v370_v3 = vunpack.c.0.s8 (!%p311_p10), %v369_v2  ;;  %s4724_s20 = smov (!%p311_p10), 94   ;;  %v360_v42 = vld [vmem:[%s5695_s1] sm:$0xf] (!%p311_p10)  ;;  %vm1115_vm5 = vcmask (!%p311_p10), 760832   ;;  %vm1309_vm6 = vcmask (!%p311_p10), 752640   ;;  %vm1503_vm7 = vcmask (!%p311_p10), 490496  }
  0x17   : > { %vm921_vm8 = vcmask (!%p311_p10), 769024   ;;  %vm1697_vm9 = vcmask (!%p311_p10), 482304   ;;  %vm5716_vm10 = vcmask (!%p311_p10), 474112   ;;  %p4060_p0 = scmp.ne.s32.totalorder (!%p311_p10), %s4702_s12, 0 }
  0x18   : > { %v373_v5 = vsub.s32 (!%p311_p10), %v370_v3, %v4874_v4 }
  0x1b   : > { %s351_s28 = scalar_select %p350_p12, %s4706_s13, 1 }
  0x1c   : > { %s353_s29 = scalar_select %p352_p13, %s4702_s12, 1 }
  0x1d   : > { %s4514_s17 = smul.u32 12, %s351_s28  ;;  %s4722_s28 = smov 127  }
  0x1e   : > { %s4513_s18 = smul.u32 6, %s353_s29  ;;  %s4725_s29 = smov 93  }
  0x20   : > { %s356_s24 = sadd.s32 %s4514_s17, %s4513_s18  ;;  %s5712_s17 = smov 60  }
  0x21   : > { %s3995_s26 = sshll.u32 %s356_s24, 1  ;;  %s5710_s18 = smov 59  }
  0x22   : > { %s358_s15 = scalar_lea.vmem %s5694_s0, %s3995_s26  ;;  %s5708_s24 = smov 58  }
  0x23   : > { %v361_v7 = vld [vmem:[%s358_s15] sm:$0xff]  ;;  %v4907_v13 = vld.sshfl [vmem:[%s358_s15 + $0x8] sm:$0x3 pattern:$0x76325410] }
  0x24   : > { %v4889_v8 = vrot.slane %v361_v7, %v373_v5  ;;  %v367_v9 = vcombine.high %v361_v7, %v361_v7  ;;  %v4016_v14 = vld.sshfl [vmem:[%s358_s15 + $0x8] sm:$0x33 pattern:$0x76325410]  ;;  %s5714_s15 = smov 92   ;;  %v564_v49 = vsel %vm410_vm1, %v4907_v13, 0 }
  0x25   : > { %v908_v15 = vcombine.high %v4016_v14, %v4016_v14 }
  0x26   : > { %391 = vrot.lane.b32.xlu0 %v4889_v8, %s4722_s28  ;;  %v4893_v10 = vrot.slane %v367_v9, %v373_v5  ;;  %v4897_v11 = vcombine.high %v4889_v8, %v4889_v8  ;;  %v552_v37 = vsel %vm410_vm1, %v4889_v8, 0  ;;  %v4008_v5 = vld [vmem:[%s5695_s1 + $0x8] sm:$0xf] }
  0x28   : > { %395 = vrot.lane.b32.xlu1 %v4893_v10, %s4722_s28  ;;  %v4903_v12 = vcombine.high %v4893_v10, %v4893_v10  ;;  %v558_v43 = vsel %vm410_vm1, %v4893_v10, 0 }
  0x2a   : > { %393 = vrot.lane.b32.xlu0 %v4897_v11, %s4722_s28 }
  0x2c   : > { %397 = vrot.lane.b32.xlu1 %v4903_v12, %s4722_s28 }
  0x2e   : > { %399 = vrot.lane.b32.xlu0 %v4907_v13, %s4722_s28 }
  0x30   : > { %718 = vrot.lane.b32.xlu1 %v4889_v8, %s4723_s19 }
  0x32   : > { %720 = vrot.lane.b32.xlu0 %v4897_v11, %s4723_s19 }
  0x34   : > { %722 = vrot.lane.b32.xlu1 %v4893_v10, %s4723_s19 }
  0x36   : > { %724 = vrot.lane.b32.xlu0 %v4903_v12, %s4723_s19 }
  0x38   : > { %726 = vrot.lane.b32.xlu1 %v4907_v13, %s4723_s19 }
  0x3a   : > { %909 = vrot.lane.b32.xlu0 %v4889_v8, %s4724_s20 }
  0x3c   : > { %911 = vrot.lane.b32.xlu1 %v4897_v11, %s4724_s20 }
  0x3e   : > { %913 = vrot.lane.b32.xlu0 %v4893_v10, %s4724_s20 }
  0x40   : > { %915 = vrot.lane.b32.xlu1 %v4903_v12, %s4724_s20 }
  0x42   : > { %917 = vrot.lane.b32.xlu0 %v4016_v14, %s4724_s20 }
  0x44   : > { %919 = vrot.lane.b32.xlu1 %v908_v15, %s4724_s20 }
  0x46   : > { %1103 = vrot.lane.b32.xlu0 %v4889_v8, %s4725_s29 }
  0x48   : > { %1105 = vrot.lane.b32.xlu1 %v4897_v11, %s4725_s29 }
  0x4a   : > { %1107 = vrot.lane.b32.xlu0 %v4893_v10, %s4725_s29 }
  0x4c   : > { %1109 = vrot.lane.b32.xlu1 %v4903_v12, %s4725_s29 }
  0x4e   : > { %1111 = vrot.lane.b32.xlu0 %v4016_v14, %s4725_s29 }
  0x50   : > { %1113 = vrot.lane.b32.xlu1 %v908_v15, %s4725_s29 }
  0x52   : > { %1297 = vrot.lane.b32.xlu0 %v4889_v8, %s5714_s15 }
  0x54   : > { %1299 = vrot.lane.b32.xlu1 %v4897_v11, %s5714_s15 }
  0x56   : > { %1301 = vrot.lane.b32.xlu0 %v4893_v10, %s5714_s15 }
  0x58   : > { %1303 = vrot.lane.b32.xlu1 %v4903_v12, %s5714_s15 }
  0x5a   : > { %1305 = vrot.lane.b32.xlu0 %v4016_v14, %s5714_s15 }
  0x5c   : > { %1307 = vrot.lane.b32.xlu1 %v908_v15, %s5714_s15  ;;  %s4732_s15 = smov 1  }
  0x5e   : > { %1491 = vrot.lane.b32.xlu0 %v4889_v8, %s5712_s17 }
  0x60   : > { %1493 = vrot.lane.b32.xlu1 %v4897_v11, %s5712_s17 }
  0x62   : > { %1495 = vrot.lane.b32.xlu0 %v4893_v10, %s5712_s17 }
  0x64   : > { %1497 = vrot.lane.b32.xlu1 %v4903_v12, %s5712_s17 }
  0x66   : > { %1499 = vrot.lane.b32.xlu0 %v4016_v14, %s5712_s17 }
  0x68   : > { %1501 = vrot.lane.b32.xlu1 %v908_v15, %s5712_s17  ;;  %s5303_s17 = scalar_lea.vmem [#allocation3], %s4880_s25 }
  0x6a   : > { %1685 = vrot.lane.b32.xlu0 %v4889_v8, %s5710_s18 }
  0x6c   : > { %1687 = vrot.lane.b32.xlu1 %v4897_v11, %s5710_s18 }
  0x6e   : > { %1689 = vrot.lane.b32.xlu0 %v4893_v10, %s5710_s18 }
  0x70   : > { %1691 = vrot.lane.b32.xlu1 %v4903_v12, %s5710_s18 }
  0x72   : > { %1693 = vrot.lane.b32.xlu0 %v4016_v14, %s5710_s18 }
  0x74   : > { %1695 = vrot.lane.b32.xlu1 %v908_v15, %s5710_s18 }
  0x76   : > { %1879 = vrot.lane.b32.xlu0 %v4889_v8, %s5708_s24 }
  0x78   : > { %1881 = vrot.lane.b32.xlu1 %v4897_v11, %s5708_s24 }
  0x7a   : > { %1883 = vrot.lane.b32.xlu0 %v4893_v10, %s5708_s24 }
  0x7c   : > { %1885 = vrot.lane.b32.xlu1 %v4903_v12, %s5708_s24 }
  0x7e   : > { %1887 = vrot.lane.b32.xlu0 %v4016_v14, %s5708_s24 }
  0x80   : > { %1889 = vrot.lane.b32.xlu1 %v908_v15, %s5708_s24 }
  0x98   : > { %v392_v16 = vpop.permute.xlu0 %391 }
  0x9a   : > { %v396_v17 = vpop.permute.xlu1 %395 }
  0x9c   : > { %v394_v18 = vpop.permute.xlu0 %393 }
  0x9d   : > { %v403_v19 = vsel %vm401_vm0, %v394_v18, %v396_v17  ;;  %v402_v20 = vsel %vm401_vm0, %v392_v16, %v394_v18 }
  0x9e   : > { %3998 = vmatprep.subr.msk.bf16.mxu0 %vm410_vm1, %v403_v19  ;;  %v398_v21 = vpop.permute.xlu1 %397  ;;  %v412_v22 = vsel %vm410_vm1, %v402_v20, 0 }
  0x9f   : > { %v404_v23 = vsel %vm401_vm0, %v396_v17, %v398_v21  ;;  %427 = vmatpush1.bf16.msra.mxu0 %v412_v22 }
  0xa0   : > { %v400_v25 = vpop.permute.xlu0 %399  ;;  %v418_v27 = vsel %vm410_vm1, %v404_v23, 0 }
  0xa1   : > { %v405_v26 = vsel %vm401_vm0, %v398_v21, %v400_v25  ;;  %v424_v33 = vsel %vm410_vm1, %v400_v25, 0 }
  0xa2   : > { %3999 = vmatmul.mubr.msk.bf16.vlgmr.msra.gmra.mrb[0].mxu0 %vm406_vm2, %v3996_v24  ;;  %4000 = vmatprep.subr.msk.bf16.mxu0 %vm410_vm1, %v405_v26  ;;  %v719_v28 = vpop.permute.xlu1 %718 }
  0xa3   : > { %468 = vmatpush1.bf16.msra.mxu0 %v418_v27  ;;  %499 = vmatprep.mubr.bf16.mxu0 %v4721_v6 }
  0xa4   : > { %4185 = vmatprep.subr.bf16.mxu0 %v4730_v29  ;;  %v721_v30 = vpop.permute.xlu0 %720 }
  0xa5   : > { %v729_v55 = vsel %vm728_vm4, %v719_v28, %v721_v30 }
  0xa6   : > { %v723_v31 = vpop.permute.xlu1 %722  ;;  %v737_v58 = vsel %vm410_vm1, %v729_v55, 0 }
  0xa7   : > { %v730_v51 = vsel %vm728_vm4, %v721_v30, %v723_v31 }
  0xa8   : > { %v725_v32 = vpop.permute.xlu0 %724 }
  0xa9   : > { %v731_v3 = vsel %vm728_vm4, %v723_v31, %v725_v32 }
  0xaa   : > { %4001 = vmatmul.mubr.msk.bf16.vlgmr.msra.gmra.mrb[4].mxu0 %vm406_vm2, %v3996_v24  ;;  %v4999_v34 = vpop.permute.xlu1 %726  ;;  %v743_v9 = vsel %vm410_vm1, %v731_v3, 0 }
  0xab   : > { %4186 = vmatpush3.bf16.msra.mxu0 %v424_v33  ;;  %4187 = vmatprep.mubr.msk.bf16.mxu0 %vm4731_vm3, %v4730_v29  ;;  %v732_v60 = vsel %vm728_vm4, %v725_v32, %v4999_v34  ;;  %v749_v19 = vsel %vm410_vm1, %v4999_v34, 0 }
  0xac   : > { %4003 = vmatprep.subr.msk.bf16.mxu0 %vm410_vm1, %v4897_v11  ;;  %v5005_v35 = vpop.permute.xlu0 %909 }
  0xae   : > { %v5007_v36 = vpop.permute.xlu1 %911 }
  0xaf   : > { %v922_v23 = vsel %vm921_vm8, %v5005_v35, %v5007_v36 }
  0xb0   : > { %v5011_v38 = vpop.permute.xlu0 %913  ;;  %v931_v26 = vsel %vm410_vm1, %v922_v23, 0 }
  0xb1   : > { %v923_v17 = vsel %vm921_vm8, %v5007_v36, %v5011_v38 }
  0xb2   : > { %4188 = vmatmul.mubr.msk.bf16.vlgmr.msra.gmra.mrb[8].mxu0 %vm406_vm2, %v3996_v24  ;;  %v5014_v39 = vpop.permute.xlu1 %915 }
  0xb3   : > { %567 = vmatpush1.bf16.msra.mxu0 %v552_v37  ;;  %598 = vmatprep.mubr.bf16.mxu0 %v4721_v6  ;;  %v924_v36 = vsel %vm921_vm8, %v5011_v38, %v5014_v39  ;;  %v4015_v37 = vld [vmem:[%s5695_s1 + $0xc] sm:$0xf]  ;;  %v2053_v38 = vld [vmem:[%s5697_s3] sm:$0xff] }
  0xb4   : > { %4005 = vmatprep.subr.msk.bf16.mxu0 %vm410_vm1, %v4903_v12  ;;  %v5019_v40 = vpop.permute.xlu0 %917  ;;  %2056 = vperm.xlu1 %4615, %v2053_v38  }
  0xb5   : > { %v925_v28 = vsel %vm921_vm8, %v5014_v39, %v5019_v40 }
  0xb6   : > { %v5021_v41 = vpop.permute.xlu1 %919 }
  0xb8   : > { %v5028_v44 = vpop.permute.xlu0 %1103 }
  0xba   : > { %4004 = vmatmul.mubr.msk.bf16.vlgmr.msra.gmra.mrb[0].mxu0 %vm406_vm2, %v360_v42  ;;  %v5031_v45 = vpop.permute.xlu1 %1105 }
  0xbb   : > { %608 = vmatpush1.bf16.msra.mxu0 %v558_v43  ;;  %639 = vmatprep.mubr.bf16.mxu0 %v4721_v6 }
  0xbc   : > { %4191 = vmatprep.subr.bf16.mxu0 %v4730_v29  ;;  %v5035_v46 = vpop.permute.xlu0 %1107 }
  0xbe   : > { %v5037_v47 = vpop.permute.xlu1 %1109 }
  0xbf   : > { %v5042_v48 = vsel %vm1115_vm5, %v5035_v46, %v5037_v47 }
  0xc0   : > { %v5046_v50 = vpop.permute.xlu0 %1111 }
  0xc2   : > { %4006 = vmatmul.mubr.msk.bf16.vlgmr.msra.gmra.mrb[4].mxu0 %vm406_vm2, %v360_v42  ;;  %v1114_v52 = vpop.permute.xlu1 %1113 }
  0xc3   : > { %4192 = vmatpush3.bf16.msra.mxu0 %v564_v49  ;;  %4193 = vmatprep.mubr.msk.bf16.mxu0 %vm4731_vm3, %v4730_v29  ;;  %v5054_v53 = vsel %vm1115_vm5, %v5046_v50, %v1114_v52  ;;  %v937_v49 = vsel %vm410_vm1, %v924_v36, 0  ;;  %v2042_v52 = vld [vmem:[%s5696_s2] sm:$0xff] }
  0xc4   : > { %4010 = vmatprep.subr.msk.bf16.mxu0 %vm410_vm1, %v730_v51  ;;  %v1298_v54 = vpop.permute.xlu0 %1297  ;;  %2045 = vperm.xlu0 %4614, %v2042_v52  }
  0xc6   : > { %v1300_v56 = vpop.permute.xlu1 %1299 }
  0xc7   : > { %v5059_v57 = vsel %vm1309_vm6, %v1298_v54, %v1300_v56 }
  0xc8   : > { %v1302_v59 = vpop.permute.xlu0 %1301 }
  0xc9   : > { %v5065_v61 = vsel %vm1309_vm6, %v1300_v56, %v1302_v59 }
  0xca   : > { %4194 = vmatmul.mubr.msk.bf16.vlgmr.msra.gmra.mrb[8].mxu0 %vm406_vm2, %v360_v42  ;;  %v1304_v62 = vpop.permute.xlu1 %1303 }
  0xcb   : > { %752 = vmatpush1.bf16.msra.mxu0 %v737_v58  ;;  %783 = vmatprep.mubr.bf16.mxu0 %v4721_v6  ;;  %v5070_v63 = vsel %vm1309_vm6, %v1302_v59, %v1304_v62  ;;  %v926_v58 = vsel %vm921_vm8, %v5019_v40, %v5021_v41  ;;  %v5179_v40 = vld [vmem:[%s5695_s1 + $0x20] sm:$0xf]  ;;  %v1116_v41 = vsel %vm1115_vm5, %v5028_v44, %v5031_v45  ;;  %v4022_v44 = vld [vmem:[%s5695_s1 + $0x10] sm:$0xf] }
  0xcc   : > { %4012 = vmatprep.subr.msk.bf16.mxu0 %vm410_vm1, %v732_v60  ;;  %v1306_v0 = vpop.permute.xlu0 %1305  ;;  %v943_v3 = vsel %vm410_vm1, %v926_v58, 0 }
  0xcd   : > { %v5074_v1 = vsel %vm1309_vm6, %v1304_v62, %v1306_v0  ;;  %v1117_v62 = vsel %vm1115_vm5, %v5031_v45, %v5035_v46  ;;  %v1125_v46 = vsel %vm410_vm1, %v1116_v41, 0  ;;  %v1131_v45 = vsel %vm410_vm1, %v5042_v48, 0 }
  0xce   : > { %v1308_v2 = vpop.permute.xlu1 %1307  ;;  %v1319_v48 = vsel %vm410_vm1, %v5059_v57, 0 }
  0xcf   : > { %v5081_v7 = vsel %vm1309_vm6, %v1306_v0, %v1308_v2 }
  0xd0   : > { %v1492_v8 = vpop.permute.xlu0 %1491  ;;  %v1331_v57 = vsel %vm410_vm1, %v5081_v7, 0 }
  0xd2   : > { %4011 = vmatmul.mubr.msk.bf16.vlgmr.msra.gmra.mrb[0].mxu0 %vm406_vm2, %v4008_v5  ;;  %v1494_v10 = vpop.permute.xlu1 %1493 }
  0xd3   : > { %793 = vmatpush1.bf16.msra.mxu0 %v743_v9  ;;  %824 = vmatprep.mubr.bf16.mxu0 %v4721_v6  ;;  %v5087_v11 = vsel %vm1503_vm7, %v1492_v8, %v1494_v10  ;;  %v4043_v9 = vld [vmem:[%s5695_s1 + $0x1c] sm:$0xf] }
  0xd4   : > { %4197 = vmatprep.subr.bf16.mxu0 %v4730_v29  ;;  %v1496_v12 = vpop.permute.xlu0 %1495 }
  0xd5   : > { %v5091_v13 = vsel %vm1503_vm7, %v1494_v10, %v1496_v12 }
  0xd6   : > { %v1498_v14 = vpop.permute.xlu1 %1497 }
  0xd7   : > { %v5094_v15 = vsel %vm1503_vm7, %v1496_v12, %v1498_v14 }
  0xd8   : > { %v1500_v16 = vpop.permute.xlu0 %1499 }
  0xd9   : > { %v5100_v18 = vsel %vm1503_vm7, %v1498_v14, %v1500_v16 }
  0xda   : > { %4013 = vmatmul.mubr.msk.bf16.vlgmr.msra.gmra.mrb[4].mxu0 %vm406_vm2, %v4008_v5  ;;  %v1502_v20 = vpop.permute.xlu1 %1501 }
  0xdb   : > { %4198 = vmatpush3.bf16.msra.mxu0 %v749_v19  ;;  %4199 = vmatprep.mubr.msk.bf16.mxu0 %vm4731_vm3, %v4730_v29  ;;  %v5108_v21 = vsel %vm1503_vm7, %v1500_v16, %v1502_v20 }
  0xdc   : > { %4017 = vmatprep.subr.msk.bf16.mxu0 %vm410_vm1, %v923_v17  ;;  %v1686_v22 = vpop.permute.xlu0 %1685  ;;  %v1525_v7 = vsel %vm410_vm1, %v5108_v21, 0 }
  0xde   : > { %v1688_v24 = vpop.permute.xlu1 %1687 }
  0xdf   : > { %v5115_v25 = vsel %vm1697_vm9, %v1686_v22, %v1688_v24 }
  0xe0   : > { %v1690_v27 = vpop.permute.xlu0 %1689  ;;  %v1707_v8 = vsel %vm410_vm1, %v5115_v25, 0 }
  0xe1   : > { %v5122_v30 = vsel %vm1697_vm9, %v1688_v24, %v1690_v27 }
  0xe2   : > { %4200 = vmatmul.mubr.msk.bf16.vlgmr.msra.gmra.mrb[8].mxu0 %vm406_vm2, %v4008_v5  ;;  %v1692_v31 = vpop.permute.xlu1 %1691  ;;  %v1119_v5 = vsel %vm1115_vm5, %v5037_v47, %v5046_v50  ;;  %v1137_v47 = vsel %vm410_vm1, %v5054_v53, 0  ;;  %v4029_v50 = vld [vmem:[%s5695_s1 + $0x14] sm:$0xf]  ;;  %v1325_v53 = vsel %vm410_vm1, %v5070_v63, 0  ;;  %v4036_v63 = vld [vmem:[%s5695_s1 + $0x18] sm:$0xf] }
  0xe3   : > { %946 = vmatpush1.bf16.msra.mxu0 %v931_v26  ;;  %977 = vmatprep.mubr.bf16.mxu0 %v4721_v6  ;;  %v5127_v32 = vsel %vm1697_vm9, %v1690_v27, %v1692_v31  ;;  %v2091_v27 = vsub.s32 2, %v4874_v4 }
  0xe4   : > { %4019 = vmatprep.subr.msk.bf16.mxu0 %vm410_vm1, %v925_v28  ;;  %v1694_v33 = vpop.permute.xlu0 %1693  ;;  %v1713_v10 = vsel %vm410_vm1, %v5127_v32, 0  ;;  %v2095_v32 = vsub.s32 3, %v4874_v4 }
  0xe5   : > { %v5131_v34 = vsel %vm1697_vm9, %v1692_v31, %v1694_v33  ;;  %v2079_v31 = vld [vmem:[%s5701_s7] sm:$0x1f] }
  0xe6   : > { %v1696_v35 = vpop.permute.xlu1 %1695  ;;  %v2092_v36 = vrot.slane %v2079_v31, %v2091_v27 }
  0xe7   : > { %v5140_v42 = vsel %vm1697_vm9, %v1694_v33, %v1696_v35 }
  0xe8   : > { %v1880_v43 = vpop.permute.xlu0 %1879 }
  0xea   : > { %4018 = vmatmul.mubr.msk.bf16.vlgmr.msra.gmra.mrb[0].mxu0 %vm406_vm2, %v4015_v37  ;;  %v1882_v51 = vpop.permute.xlu1 %1881 }
  0xeb   : > { %987 = vmatpush1.bf16.msra.mxu0 %v937_v49  ;;  %1018 = vmatprep.mubr.bf16.mxu0 %v4721_v6  ;;  %v5152_v39 = vsel %vm5716_vm10, %v1880_v43, %v1882_v51 }
  0xec   : > { %4203 = vmatprep.subr.bf16.mxu0 %v4730_v29  ;;  %v1884_v54 = vpop.permute.xlu0 %1883  ;;  %v1901_v12 = vsel %vm410_vm1, %v5152_v39, 0 }
  0xed   : > { %v5156_v55 = vsel %vm5716_vm10, %v1882_v51, %v1884_v54 }
  0xee   : > { %v1886_v56 = vpop.permute.xlu1 %1885 }
  0xef   : > { %v1894_v59 = vsel %vm5716_vm10, %v1884_v54, %v1886_v56 }
  0xf0   : > { %v5162_v60 = vpop.permute.xlu0 %1887  ;;  %v1907_v2 = vsel %vm410_vm1, %v1894_v59, 0  ;;  %v2087_v59 = vsub.s32 1, %v4874_v4 }
  0xf1   : > { %v1895_v0 = vsel %vm5716_vm10, %v1886_v56, %v5162_v60 }
  0xf2   : > { %4020 = vmatmul.mubr.msk.bf16.vlgmr.msra.gmra.mrb[4].mxu0 %vm406_vm2, %v4015_v37  ;;  %4054 = vmatprep.subr.msk.bf16.mxu1 %vm410_vm1, %v1895_v0 }
  0xf3   : > { %4204 = vmatpush3.bf16.msra.mxu0 %v943_v3  ;;  %4205 = vmatprep.mubr.msk.bf16.mxu0 %vm4731_vm3, %v4730_v29 }
  0xf4   : > { %4024 = vmatprep.subr.msk.bf16.mxu0 %vm410_vm1, %v1117_v62  ;;  %1957 = vmatpush1.bf16.msra.mxu1 %v1907_v2 }
  0xf7   : > { %4055 = vmatmul.mubr.msk.bf16.vlgmr.msra.gmra.mrb[0].mxu1 %vm406_vm2, %v5179_v40 }
  0xfa   : > { %4206 = vmatmul.mubr.msk.bf16.vlgmr.msra.gmra.mrb[8].mxu0 %vm406_vm2, %v4015_v37 }
  0xfb   : > { %1140 = vmatpush1.bf16.msra.mxu0 %v1125_v46  ;;  %1171 = vmatprep.mubr.bf16.mxu0 %v4721_v6  ;;  %v2088_v46 = vrot.slane %v2079_v31, %v2087_v59 }
  0xfc   : > { %4026 = vmatprep.subr.msk.bf16.mxu0 %vm410_vm1, %v1119_v5 }
 0x102   : > { %4025 = vmatmul.mubr.msk.bf16.vlgmr.msra.gmra.mrb[0].mxu0 %vm406_vm2, %v4022_v44 }
 0x103   : > { %1181 = vmatpush1.bf16.msra.mxu0 %v1131_v45  ;;  %1212 = vmatprep.mubr.bf16.mxu0 %v4721_v6 }
 0x104   : > { %4209 = vmatprep.subr.bf16.mxu0 %v4730_v29 }
 0x10a   : > { %4027 = vmatmul.mubr.msk.bf16.vlgmr.msra.gmra.mrb[4].mxu0 %vm406_vm2, %v4022_v44 }
 0x10b   : > { %4210 = vmatpush3.bf16.msra.mxu0 %v1137_v47  ;;  %4211 = vmatprep.mubr.msk.bf16.mxu0 %vm4731_vm3, %v4730_v29 }
 0x10c   : > { %4031 = vmatprep.subr.msk.bf16.mxu0 %vm410_vm1, %v5065_v61  ;;  %v1513_v61 = vsel %vm410_vm1, %v5087_v11, 0  ;;  %v1719_v11 = vsel %vm410_vm1, %v5140_v42, 0  ;;  %v2096_v42 = vrot.slane %v2079_v31, %v2095_v32 }
 0x112   : > { %4212 = vmatmul.mubr.msk.bf16.vlgmr.msra.gmra.mrb[8].mxu0 %vm406_vm2, %v4022_v44 }
 0x113   : > { %1334 = vmatpush1.bf16.msra.mxu0 %v1319_v48  ;;  %1365 = vmatprep.mubr.bf16.mxu0 %v4721_v6 }
 0x114   : > { %4033 = vmatprep.subr.msk.bf16.mxu0 %vm410_vm1, %v5074_v1  ;;  %v1519_v1 = vsel %vm410_vm1, %v5094_v15, 0 }
 0x11a   : > { %4032 = vmatmul.mubr.msk.bf16.vlgmr.msra.gmra.mrb[0].mxu0 %vm406_vm2, %v4029_v50 }
 0x11b   : > { %1375 = vmatpush1.bf16.msra.mxu0 %v1325_v53  ;;  %1406 = vmatprep.mubr.bf16.mxu0 %v4721_v6 }
 0x11c   : > { %4215 = vmatprep.subr.bf16.mxu0 %v4730_v29 }
 0x122   : > { %4034 = vmatmul.mubr.msk.bf16.vlgmr.msra.gmra.mrb[4].mxu0 %vm406_vm2, %v4029_v50 }
 0x123   : > { %4216 = vmatpush3.bf16.msra.mxu0 %v1331_v57  ;;  %4217 = vmatprep.mubr.msk.bf16.mxu0 %vm4731_vm3, %v4730_v29 }
 0x124   : > { %4038 = vmatprep.subr.msk.bf16.mxu0 %vm410_vm1, %v5091_v13  ;;  %v1890_v13 = vpop.permute.xlu1 %1889 }
 0x125   : > { %v1896_v14 = vsel %vm5716_vm10, %v5162_v60, %v1890_v13  ;;  %vm2155_vm10 = vcmask 814872  }
 0x126   : > { %v1913_v15 = vsel %vm410_vm1, %v1896_v14, 0 }
 0x12a   : > { %4218 = vmatmul.mubr.msk.bf16.vlgmr.msra.gmra.mrb[8].mxu0 %vm406_vm2, %v4029_v50  ;;  %v2099_v50 = vsub.s32 4, %v4874_v4 }
 0x12b   : > { %1528 = vmatpush1.bf16.msra.mxu0 %v1513_v61  ;;  %1559 = vmatprep.mubr.bf16.mxu0 %v4721_v6 }
 0x12c   : > { %4040 = vmatprep.subr.msk.bf16.mxu0 %vm410_vm1, %v5100_v18 }
 0x132   : > { %4039 = vmatmul.mubr.msk.bf16.vlgmr.msra.gmra.mrb[0].mxu0 %vm406_vm2, %v4036_v63 }
 0x133   : > { %1569 = vmatpush1.bf16.msra.mxu0 %v1519_v1  ;;  %1600 = vmatprep.mubr.bf16.mxu0 %v4721_v6  ;;  %v2057_v26 = vpop.permute.xlu1 %2056 }
 0x134   : > { %4221 = vmatprep.subr.bf16.mxu0 %v4730_v29 }
 0x13a   : > { %4041 = vmatmul.mubr.msk.bf16.vlgmr.msra.gmra.mrb[4].mxu0 %vm406_vm2, %v4036_v63 }
 0x13b   : > { %4222 = vmatpush3.bf16.msra.mxu0 %v1525_v7  ;;  %4223 = vmatprep.mubr.msk.bf16.mxu0 %vm4731_vm3, %v4730_v29 }
 0x13c   : > { %4045 = vmatprep.subr.msk.bf16.mxu0 %vm410_vm1, %v5122_v30 }
 0x142   : > { %4224 = vmatmul.mubr.msk.bf16.vlgmr.msra.gmra.mrb[8].mxu0 %vm406_vm2, %v4036_v63 }
 0x143   : > { %1722 = vmatpush1.bf16.msra.mxu0 %v1707_v8  ;;  %1753 = vmatprep.mubr.bf16.mxu0 %v4721_v6  ;;  %v2046_v21 = vpop.permute.xlu0 %2045 }
 0x144   : > { %4047 = vmatprep.subr.msk.bf16.mxu0 %vm410_vm1, %v5131_v34 }
 0x14a   : > { %4046 = vmatmul.mubr.msk.bf16.vlgmr.msra.gmra.mrb[0].mxu0 %vm406_vm2, %v4043_v9 }
 0x14b   : > { %1763 = vmatpush1.bf16.msra.mxu0 %v1713_v10  ;;  %1794 = vmatprep.mubr.bf16.mxu0 %v4721_v6 }
 0x14c   : > { %4227 = vmatprep.subr.bf16.mxu0 %v4730_v29 }
 0x152   : > { %4048 = vmatmul.mubr.msk.bf16.vlgmr.msra.gmra.mrb[4].mxu0 %vm406_vm2, %v4043_v9 }
 0x153   : > { %4228 = vmatpush3.bf16.msra.mxu0 %v1719_v11  ;;  %4229 = vmatprep.mubr.msk.bf16.mxu0 %vm4731_vm3, %v4730_v29 }
 0x154   : > { %4052 = vmatprep.subr.msk.bf16.mxu0 %vm410_vm1, %v5156_v55  ;;  %v2083_v55 = vsub.s32 0, %v4874_v4  ;;  %vm2146_vm1 = vcmask 1043464  }
 0x15a   : > { %4230 = vmatmul.mubr.msk.bf16.vlgmr.msra.gmra.mrb[8].mxu0 %vm406_vm2, %v4043_v9  ;;  %v2100_v9 = vrot.slane %v2079_v31, %v2099_v50 }
 0x15b   : > { %1916 = vmatpush1.bf16.msra.mxu0 %v1901_v12  ;;  %1947 = vmatprep.mubr.bf16.mxu0 %v4721_v6 }
 0x15c   : > { %4233 = vmatprep.subr.bf16.mxu0 %v4730_v29 }
 0x162   : > { %4053 = vmatmul.mubr.msk.bf16.vlgmr.msra.gmra.mrb[0].mxu0 %vm406_vm2, %v5179_v40 }
 0x163   : > { %4234 = vmatpush3.bf16.msra.mxu0 %v1913_v15  ;;  %4235 = vmatprep.mubr.msk.bf16.mxu0 %vm4731_vm3, %v4730_v29 }
 0x16a   : > { %4236 = vmatmul.mubr.msk.bf16.vlgmr.msra.gmra.mrb[8].mxu0 %vm406_vm2, %v5179_v40  ;;  %v2084_v40 = vrot.slane %v2079_v31, %v2083_v55  ;;  %vm2147_vm2 = vcmask 1047556  }
 0x1ca   : > { %v1990_v16 = vpop.f32.mrb[0].mxu1 }
 0x1cb   : > { %v1992_v17 = vpop.f32.mrb[1].mxu1 }
 0x1cc   : > { %v1994_v18 = vpop.f32.mrb[2].mxu1 }
 0x1cd   : > { %v1995_v19 = vpop.f32.mrb[3].mxu1 }
 0x225   : > { %v1796_v20 = vpop.f32.mrb[4].mxu0 }
 0x226   : > { %v4323_v22 = vadd.f32 %v1990_v16, %v1796_v20  ;;  %v1798_v23 = vpop.f32.mrb[5].mxu0 }
 0x227   : > { %v4324_v24 = vadd.f32 %v1992_v17, %v1798_v23  ;;  %v1800_v25 = vpop.f32.mrb[6].mxu0 }
 0x228   : > { %v2050_v28 = vmul.f32 %v4323_v22, %v2046_v21  ;;  %v1801_v30 = vpop.f32.mrb[7].mxu0  ;;  %v4733_v22 = vmov (!%p4060_p0), 0  }
 0x229   : > { %v2051_v33 = vmul.f32 %v4324_v24, %v2046_v21 }
 0x22a   : > { %v2061_v34 = vadd.f32 %v2057_v26, %v2050_v28 }
 0x22b   : > { %v2062_v35 = vadd.f32 %v2057_v26, %v2051_v33 }
 0x22c   : > { %vm2066_vm11 = vcmp.gt.f32.partialorder %v2061_v34, 0.0  ;;  %v2071_v37 = vmul.f32 0.01, %v2061_v34 }
 0x22d   : > { %vm2067_vm12 = vcmp.gt.f32.partialorder %v2062_v35, 0.0  ;;  %v2072_v43 = vmul.f32 0.01, %v2062_v35 }
 0x22e   : > { %v2076_v49 = vsel %vm2066_vm11, %v2061_v34, %v2071_v37  ;;  %vm2137_vm11 = vcmask 7168  }
 0x22f   : > { %v2077_v51 = vsel %vm2067_vm12, %v2062_v35, %v2072_v43  ;;  %v2108_v52 = vmul.f32 %v2092_v36, %v2076_v49  ;;  %vm2139_vm12 = vcmask 1043456  }
 0x230   : > { %v2109_v38 = vmul.f32 %v2096_v42, %v2077_v51 }
 0x232   : > { %v4135_v39 = vpack.c.bf16 %v2109_v38, %v2108_v52 }
 0x234   : > { %2131 = vrot.lane.b32.xlu0 %v4135_v39, %s4732_s15 }
 0x235   : > { %v1949_v54 = vpop.f32.mrb[0].mxu0 }
 0x236   : > { %v2048_v56 = vmul.f32 %v2046_v21, %v1949_v54  ;;  %v1951_v58 = vpop.f32.mrb[1].mxu0 }
 0x237   : > { %v2049_v60 = vmul.f32 %v2046_v21, %v1951_v58  ;;  %v1953_v62 = vpop.f32.mrb[2].mxu0 }
 0x238   : > { %v2059_v0 = vadd.f32 %v2057_v26, %v2048_v56  ;;  %v1954_v2 = vpop.f32.mrb[3].mxu0 }
 0x239   : > { %v2060_v3 = vadd.f32 %v2057_v26, %v2049_v60 }
 0x23a   : > { %vm2064_vm13 = vcmp.gt.f32.partialorder %v2059_v0, 0.0  ;;  %v2069_v41 = vmul.f32 0.01, %v2059_v0 }
 0x23b   : > { %vm2065_vm14 = vcmp.gt.f32.partialorder %v2060_v3, 0.0  ;;  %v2070_v5 = vmul.f32 0.01, %v2060_v3 }
 0x23c   : > { %v2074_v44 = vsel %vm2064_vm13, %v2059_v0, %v2069_v41  ;;  %vm2148_vm13 = vmor %vm2147_vm2, %vm2146_vm1  ;;  %vm2161_vm1 = vcmask (!%p4060_p0), 273408  }
 0x23d   : > { %v2031_v45 = vpop.f32.mrb[8].mxu0  ;;  %v2075_v47 = vsel %vm2065_vm14, %v2060_v3, %v2070_v5  ;;  %v2106_v48 = vmul.f32 %v2084_v40, %v2074_v44  ;;  %vm2153_vm14 = vcmask 3072  }
 0x23e   : > { %v2052_v53 = vmul.f32 %v2046_v21, %v2031_v45  ;;  %v4237_v57 = vpop.f32.mrb[9].mxu0  ;;  %v2107_v61 = vmul.f32 %v2088_v46, %v2075_v47 }
 0x23f   : > { %v2034_v63 = vpop.f32.mrb[10].mxu0 }
 0x240   : > { %v2063_v1 = vadd.f32 %v2057_v26, %v2052_v53  ;;  %v4238_v7 = vpop.f32.mrb[11].mxu0  ;;  %v4134_v8 = vpack.c.bf16 %v2107_v61, %v2106_v48 }
 0x242   : > { %vm2068_vm15 = vcmp.gt.f32.partialorder %v2063_v1, 0.0  ;;  %v2073_v10 = vmul.f32 0.01, %v2063_v1  ;;  %2129 = vrot.lane.b32.xlu1 %v4134_v8, %s4732_s15 }
 0x244   : > { %v2078_v11 = vsel %vm2068_vm15, %v2063_v1, %v2073_v10  ;;  %vm2151_vm15 = vcmask 805888  }
 0x245   : > { %v2110_v12 = vmul.f32 %v2100_v9, %v2078_v11 }
 0x247   : > { %v4136_v13 = vpack.c.bf16 %v2110_v12, %v2110_v12 }
 0x249   : > { %2133 = vrot.lane.b32.xlu1 %v4136_v13, %s4732_s15 }
 0x2a6   : > { %v2132_v14 = vpop.permute.xlu0 %2131 }
 0x2a7   : > { %v2136_v15 = vrot.slane %v2132_v14, 4 }
 0x2b4   : > { %v2130_v4 = vpop.permute.xlu1 %2129 }
 0x2b5   : > { %v2135_v16 = vrot.slane %v2130_v4, 4 }
 0x2b7   : > { %v2138_v17 = vsel %vm2137_vm11, %v2135_v16, %v2130_v4  ;;  %v2140_v18 = vsel %vm2139_vm12, %v2135_v16, %v2136_v15 }
 0x2b8   : > { %v2141_v19 = vsel %vm2137_vm11, %v2140_v18, %v2132_v14  ;;  %2149 = vst.msk [vmem:[#allocation2] sm:$0xff] %vm2148_vm13, %v2138_v17  ;;  %2160 = sbr.rel (%p4060_p0) target bundleno = 703 (0x2bf), region = 60 }
 0x2b9   : > { %2150 = vst [vmem:[#allocation2 + $0x8] sm:$0xff] %v2141_v19  ;;  %2154 = vst.msk [vmem:[#allocation2] sm:$0xf] %vm2153_vm14, %v4721_v6 }
 0x2ba   : > { %2162 = vst.msk [vmem:[#allocation2] sm:$0xf] (!%p4060_p0), %vm2161_vm1, %v4733_v22 }
 0x2bb   : > { %v2134_v20 = vpop.permute.xlu1 %2133 }
 0x2bc   : > { %v2142_v21 = vsel %vm2137_vm11, %v2136_v15, %v2134_v20 }
 0x2bd   : > { %2152 = vst.msk [vmem:[#allocation2 + $0x10] sm:$0xf] %vm2151_vm15, %v2142_v21 }
 0x2be   : > { %2156 = vst.msk [vmem:[#allocation2 + $0x10] sm:$0xf] %vm2155_vm10, %v4721_v6 }
 0x2bf PF: > { %p4061_p1 = scmp.ne.s32.totalorder %s4702_s12, 1 }
 0x2c0   : > { %vm2167_vm2 = vcmask (!%p4061_p1), 814608   ;;  %v4734_v23 = vmov (!%p4061_p1), 0  }
 0x2c1   : > { %2166 = sbr.rel (%p4061_p1) target bundleno = 712 (0x2c8), region = 64  ;;  %2168 = vst.msk [vmem:[#allocation2 + $0x10] sm:$0xf] (!%p4061_p1), %vm2167_vm2, %v4734_v23 }
 0x2c8 PF: > { %v2171_v24 = vld [vmem:[#allocation2 + $0x8] sm:$0xff]  ;;  %v2170_v25 = vld [vmem:[#allocation2] sm:$0xff]  ;;  %2254 = vmatprep.mubr.bf16.mxu1 %v4721_v6  ;;  %4617 = vset.pattern.permute.xlu0 %v4721_v6  ;;  %v5326_v31 = vld [vmem:[#allocation2 + $0x10] ss:$0 sps:$4 sm:$0xff]   ;;  %s5722_s25 = smov 92   ;;  %s5725_s18 = smov 58  }
 0x2c9   : > { %v5309_v26 = vcombine.low %v2171_v24, %v2171_v24  ;;  %v5311_v27 = vcombine.low %v2170_v25, %v2170_v25  ;;  %4618 = vset.pattern.permute.xlu1 %v4721_v6  ;;  %v5318_v28 = vcombine.high %v2171_v24, %v2171_v24  ;;  %v5320_v30 = vcombine.high %v2170_v25, %v2170_v25  ;;  %v4062_v49 = vld [vmem:[%s5698_s4 + $0x4] sm:$0xf]  ;;  %v2169_v55 = vld [vmem:[%s5698_s4] sm:$0xf]  ;;  %v4078_v44 = vld [vmem:[%s5698_s4 + $0x8] sm:$0xf] }
 0x2ca   : > { %vm2202_vm10 = vcmask 64512   ;;  %v2360_v62 = vsel %vm2139_vm12, %v5326_v31, 0  ;;  %v4084_v10 = vld [vmem:[%s5698_s4 + $0xc] sm:$0xf]  ;;  %v3611_v16 = vld [vmem:[%s5699_s5] sm:$0xff]  ;;  %vm3739_vm14 = vcmask 1046528  }
 0x2cb   : > { %2192 = vrot.lane.b32.xlu1 %v5309_v26, %s4722_s28  ;;  %2188 = vrot.lane.b32.xlu0 %v5311_v27, %s4722_s28  ;;  %v2348_v54 = vsel %vm2139_vm12, %v5311_v27, 0  ;;  %v2354_v56 = vsel %vm2139_vm12, %v5309_v26, 0  ;;  %v3622_v17 = vld [vmem:[%s5700_s6] sm:$0xff]  ;;  %v4090_v24 = vld [vmem:[%s5698_s4 + $0x10] sm:$0xf]  ;;  %vm4735_vm15 = vmmov 1  }
 0x2cc   : > { %vm4318_vm1 = vmpackc.low %vm3739_vm14, %vm4735_vm15  ;;  %vm3722_vm2 = vcmask 252928   ;;  %s4737_s21 = smov 52   ;;  %s4739_s26 = smov 112  }
 0x2cd   : > { %s4740_s15 = smov 36   ;;  %s4745_s24 = smov 80  }
 0x2cf   : > { %2194 = vrot.lane.b32.xlu1 %v5318_v28, %s4722_s28  ;;  %2190 = vrot.lane.b32.xlu0 %v5320_v30, %s4722_s28 }
 0x2d3   : > { %2196 = vrot.lane.b32.xlu0 %v5326_v31, %s4722_s28  ;;  %2486 = vrot.lane.b32.xlu1 %v5311_v27, %s4723_s19 }
 0x2d7   : > { %2488 = vrot.lane.b32.xlu0 %v5320_v30, %s4723_s19  ;;  %2490 = vrot.lane.b32.xlu1 %v5309_v26, %s4723_s19 }
 0x2db   : > { %2492 = vrot.lane.b32.xlu0 %v5318_v28, %s4723_s19  ;;  %2494 = vrot.lane.b32.xlu1 %v5326_v31, %s4723_s19  ;;  %s5723_s19 = smov 60  }
 0x2df   : > { %2647 = vrot.lane.b32.xlu0 %v5311_v27, %s4724_s20  ;;  %2649 = vrot.lane.b32.xlu1 %v5320_v30, %s4724_s20 }
 0x2e3   : > { %2651 = vrot.lane.b32.xlu0 %v5309_v26, %s4724_s20  ;;  %2653 = vrot.lane.b32.xlu1 %v5318_v28, %s4724_s20 }
 0x2e7   : > { %2655 = vrot.lane.b32.xlu0 %v5326_v31, %s4724_s20  ;;  %2808 = vrot.lane.b32.xlu1 %v5311_v27, %s4725_s29 }
 0x2eb   : > { %2810 = vrot.lane.b32.xlu0 %v5320_v30, %s4725_s29  ;;  %2812 = vrot.lane.b32.xlu1 %v5309_v26, %s4725_s29 }
 0x2ef   : > { %2814 = vrot.lane.b32.xlu0 %v5318_v28, %s4725_s29  ;;  %2816 = vrot.lane.b32.xlu1 %v5326_v31, %s4725_s29  ;;  %s5724_s29 = smov 59  }
 0x2f3   : > { %2969 = vrot.lane.b32.xlu0 %v5311_v27, %s5722_s25  ;;  %2971 = vrot.lane.b32.xlu1 %v5320_v30, %s5722_s25 }
 0x2f7   : > { %2973 = vrot.lane.b32.xlu0 %v5309_v26, %s5722_s25  ;;  %2975 = vrot.lane.b32.xlu1 %v5318_v28, %s5722_s25 }
 0x2fb   : > { %2977 = vrot.lane.b32.xlu0 %v5326_v31, %s5722_s25  ;;  %3130 = vrot.lane.b32.xlu1 %v5311_v27, %s5723_s19  ;;  %s4741_s25 = smov 104  }
 0x2ff   : > { %3132 = vrot.lane.b32.xlu0 %v5320_v30, %s5723_s19  ;;  %3134 = vrot.lane.b32.xlu1 %v5309_v26, %s5723_s19 }
 0x303   : > { %3136 = vrot.lane.b32.xlu0 %v5318_v28, %s5723_s19  ;;  %3138 = vrot.lane.b32.xlu1 %v5326_v31, %s5723_s19 }
 0x307   : > { %3291 = vrot.lane.b32.xlu0 %v5311_v27, %s5724_s29  ;;  %3293 = vrot.lane.b32.xlu1 %v5320_v30, %s5724_s29 }
 0x30b   : > { %3295 = vrot.lane.b32.xlu0 %v5309_v26, %s5724_s29  ;;  %3297 = vrot.lane.b32.xlu1 %v5318_v28, %s5724_s29 }
 0x30f   : > { %3299 = vrot.lane.b32.xlu0 %v5326_v31, %s5724_s29  ;;  %3452 = vrot.lane.b32.xlu1 %v5311_v27, %s5725_s18  ;;  %s4743_s29 = smov 48  }
 0x313   : > { %3454 = vrot.lane.b32.xlu0 %v5320_v30, %s5725_s18  ;;  %3456 = vrot.lane.b32.xlu1 %v5309_v26, %s5725_s18 }
 0x317   : > { %3458 = vrot.lane.b32.xlu0 %v5318_v28, %s5725_s18  ;;  %3460 = vrot.lane.b32.xlu1 %v5326_v31, %s5725_s18  ;;  %s4744_s18 = smov 32  }
 0x31b   : > { %3614 = vperm.xlu0 %4617, %v3611_v16   ;;  %3625 = vperm.xlu1 %4618, %v3622_v17  }
 0x33d   : > { %v2193_v32 = vpop.permute.xlu1 %2192  ;;  %v2189_v33 = vpop.permute.xlu0 %2188 }
 0x341   : > { %v2195_v34 = vpop.permute.xlu1 %2194  ;;  %v2191_v35 = vpop.permute.xlu0 %2190 }
 0x342   : > { %v2199_v36 = vsel %vm401_vm0, %v2191_v35, %v2193_v32  ;;  %v2198_v37 = vsel %vm401_vm0, %v2189_v33, %v2191_v35  ;;  %v2200_v43 = vsel %vm401_vm0, %v2193_v32, %v2195_v34 }
 0x343   : > { %4068 = vmatprep.subr.msk.bf16.mxu1 %vm2139_vm12, %v2199_v36  ;;  %v2208_v42 = vsel %vm2139_vm12, %v2198_v37, 0  ;;  %v2214_v38 = vsel %vm2139_vm12, %v2200_v43, 0 }
 0x344   : > { %2223 = vmatpush1.bf16.msra.mxu1 %v2208_v42  ;;  %v4096_v42 = vld [vmem:[%s5698_s4 + $0x14] sm:$0xf] }
 0x345   : > { %v2197_v51 = vpop.permute.xlu0 %2196  ;;  %v2487_v58 = vpop.permute.xlu1 %2486 }
 0x346   : > { %v2201_v52 = vsel %vm401_vm0, %v2195_v34, %v2197_v51  ;;  %v2220_v39 = vsel %vm2139_vm12, %v2197_v51, 0 }
 0x347   : > { %4069 = vmatmul.mubr.msk.bf16.vlgmr.msra.gmra.mrb[4].mxu1 %vm2202_vm10, %v4062_v49  ;;  %4070 = vmatprep.subr.msk.bf16.mxu1 %vm2139_vm12, %v2201_v52 }
 0x348   : > { %2264 = vmatpush1.bf16.msra.mxu1 %v2214_v38  ;;  %2295 = vmatprep.mubr.bf16.mxu1 %v4721_v6 }
 0x349   : > { %4239 = vmatprep.subr.bf16.mxu1 %v4730_v29  ;;  %v2489_v59 = vpop.permute.xlu0 %2488  ;;  %v2491_v60 = vpop.permute.xlu1 %2490 }
 0x34a   : > { %v2497_v0 = vsel %vm728_vm4, %v2489_v59, %v2491_v60  ;;  %v2496_v2 = vsel %vm728_vm4, %v2487_v58, %v2489_v59 }
 0x34b   : > { %v2504_v40 = vsel %vm2139_vm12, %v2496_v2, 0 }
 0x34d   : > { %v2495_v3 = vpop.permute.xlu1 %2494  ;;  %v2493_v41 = vpop.permute.xlu0 %2492 }
 0x34e   : > { %v2499_v46 = vsel %vm728_vm4, %v2493_v41, %v2495_v3  ;;  %v2498_v5 = vsel %vm728_vm4, %v2491_v60, %v2493_v41  ;;  %v2516_v57 = vsel %vm2139_vm12, %v2495_v3, 0  ;;  %vm5726_vm4 = vcmask 474112  }
 0x34f   : > { %4071 = vmatmul.mubr.msk.bf16.vlgmr.msra.gmra.mrb[8].mxu1 %vm2202_vm10, %v4062_v49  ;;  %v2510_v47 = vsel %vm2139_vm12, %v2498_v5, 0 }
 0x350   : > { %4240 = vmatpush3.bf16.msra.mxu1 %v2220_v39  ;;  %4241 = vmatprep.mubr.msk.bf16.mxu1 %vm4731_vm3, %v4730_v29 }
 0x351   : > { %4073 = vmatprep.subr.msk.bf16.mxu1 %vm2139_vm12, %v5320_v30  ;;  %v2648_v45 = vpop.permute.xlu0 %2647  ;;  %v2650_v48 = vpop.permute.xlu1 %2649 }
 0x352   : > { %v2657_v61 = vsel %vm921_vm8, %v2648_v45, %v2650_v48 }
 0x353   : > { %v2665_v1 = vsel %vm2139_vm12, %v2657_v61, 0 }
 0x355   : > { %v2652_v50 = vpop.permute.xlu0 %2651  ;;  %v2654_v7 = vpop.permute.xlu1 %2653 }
 0x356   : > { %v2658_v53 = vsel %vm921_vm8, %v2650_v48, %v2652_v50  ;;  %v2659_v9 = vsel %vm921_vm8, %v2652_v50, %v2654_v7 }
 0x357   : > { %4242 = vmatmul.mubr.msk.bf16.vlgmr.msra.gmra.mrb[12].mxu1 %vm2202_vm10, %v4062_v49  ;;  %v2671_v12 = vsel %vm2139_vm12, %v2659_v9, 0 }
 0x358   : > { %2363 = vmatpush1.bf16.msra.mxu1 %v2348_v54  ;;  %2394 = vmatprep.mubr.bf16.mxu1 %v4721_v6 }
 0x359   : > { %4075 = vmatprep.subr.msk.bf16.mxu1 %vm2139_vm12, %v5318_v28  ;;  %v2656_v63 = vpop.permute.xlu0 %2655  ;;  %v2809_v11 = vpop.permute.xlu1 %2808 }
 0x35a   : > { %v2660_v8 = vsel %vm921_vm8, %v2654_v7, %v2656_v63  ;;  %v2677_v15 = vsel %vm2139_vm12, %v2656_v63, 0 }
 0x35d   : > { %v2811_v13 = vpop.permute.xlu0 %2810  ;;  %v2813_v14 = vpop.permute.xlu1 %2812 }
 0x35e   : > { %v2819_v4 = vsel %vm1115_vm5, %v2811_v13, %v2813_v14  ;;  %v2818_v18 = vsel %vm1115_vm5, %v2809_v11, %v2811_v13 }
 0x35f   : > { %4074 = vmatmul.mubr.msk.bf16.vlgmr.msra.gmra.mrb[4].mxu1 %vm2202_vm10, %v2169_v55  ;;  %v2826_v20 = vsel %vm2139_vm12, %v2818_v18, 0 }
 0x360   : > { %2404 = vmatpush1.bf16.msra.mxu1 %v2354_v56  ;;  %2435 = vmatprep.mubr.bf16.mxu1 %v4721_v6 }
 0x361   : > { %4245 = vmatprep.subr.bf16.mxu1 %v4730_v29  ;;  %v2817_v19 = vpop.permute.xlu1 %2816  ;;  %v2815_v21 = vpop.permute.xlu0 %2814 }
 0x362   : > { %v2821_v22 = vsel %vm1115_vm5, %v2815_v21, %v2817_v19  ;;  %v2820_v23 = vsel %vm1115_vm5, %v2813_v14, %v2815_v21  ;;  %v2838_v31 = vsel %vm2139_vm12, %v2817_v19, 0  ;;  %vm5727_vm5 = vmmov %vm5726_vm4 }
 0x363   : > { %v2832_v26 = vsel %vm2139_vm12, %v2820_v23, 0 }
 0x365   : > { %v2970_v25 = vpop.permute.xlu0 %2969  ;;  %v2972_v27 = vpop.permute.xlu1 %2971 }
 0x366   : > { %v2979_v32 = vsel %vm1309_vm6, %v2970_v25, %v2972_v27 }
 0x367   : > { %4076 = vmatmul.mubr.msk.bf16.vlgmr.msra.gmra.mrb[8].mxu1 %vm2202_vm10, %v2169_v55  ;;  %v2987_v34 = vsel %vm2139_vm12, %v2979_v32, 0 }
 0x368   : > { %4246 = vmatpush3.bf16.msra.mxu1 %v2360_v62  ;;  %4247 = vmatprep.mubr.msk.bf16.mxu1 %vm4731_vm3, %v4730_v29  ;;  %v4102_v62 = vld [vmem:[%s5698_s4 + $0x18] sm:$0xf] }
 0x369   : > { %4079 = vmatprep.subr.msk.bf16.mxu1 %vm2139_vm12, %v2497_v0  ;;  %v2974_v28 = vpop.permute.xlu0 %2973  ;;  %v2976_v35 = vpop.permute.xlu1 %2975 }
 0x36a   : > { %v2980_v30 = vsel %vm1309_vm6, %v2972_v27, %v2974_v28  ;;  %v2981_v37 = vsel %vm1309_vm6, %v2974_v28, %v2976_v35 }
 0x36b   : > { %v2993_v49 = vsel %vm2139_vm12, %v2981_v37, 0 }
 0x36d   : > { %v2978_v33 = vpop.permute.xlu0 %2977  ;;  %v3131_v43 = vpop.permute.xlu1 %3130 }
 0x36e   : > { %v2982_v36 = vsel %vm1309_vm6, %v2976_v35, %v2978_v33  ;;  %v2999_v39 = vsel %vm2139_vm12, %v2978_v33, 0  ;;  %vm5728_vm6 = vmmov %vm5726_vm4 }
 0x36f   : > { %4248 = vmatmul.mubr.msk.bf16.vlgmr.msra.gmra.mrb[12].mxu1 %vm2202_vm10, %v2169_v55 }
 0x370   : > { %2519 = vmatpush1.bf16.msra.mxu1 %v2504_v40  ;;  %2550 = vmatprep.mubr.bf16.mxu1 %v4721_v6 }
 0x371   : > { %4081 = vmatprep.subr.msk.bf16.mxu1 %vm2139_vm12, %v2499_v46  ;;  %v3133_v51 = vpop.permute.xlu0 %3132  ;;  %v3135_v52 = vpop.permute.xlu1 %3134 }
 0x372   : > { %v3141_v38 = vsel %vm1503_vm7, %v3133_v51, %v3135_v52  ;;  %v3140_v54 = vsel %vm1503_vm7, %v3131_v43, %v3133_v51 }
 0x373   : > { %v3148_v56 = vsel %vm2139_vm12, %v3140_v54, 0 }
 0x375   : > { %v3139_v55 = vpop.permute.xlu1 %3138  ;;  %v3137_v58 = vpop.permute.xlu0 %3136 }
 0x376   : > { %v3143_v59 = vsel %vm1503_vm7, %v3137_v58, %v3139_v55  ;;  %v3142_v60 = vsel %vm1503_vm7, %v3135_v52, %v3137_v58  ;;  %v3160_v46 = vsel %vm2139_vm12, %v3139_v55, 0  ;;  %vm5729_vm7 = vmmov %vm5726_vm4 }
 0x377   : > { %4080 = vmatmul.mubr.msk.bf16.vlgmr.msra.gmra.mrb[4].mxu1 %vm2202_vm10, %v4078_v44  ;;  %v3154_v2 = vsel %vm2139_vm12, %v3142_v60, 0 }
 0x378   : > { %2560 = vmatpush1.bf16.msra.mxu1 %v2510_v47  ;;  %2591 = vmatprep.mubr.bf16.mxu1 %v4721_v6 }
 0x379   : > { %4251 = vmatprep.subr.bf16.mxu1 %v4730_v29  ;;  %v3292_v0 = vpop.permute.xlu0 %3291  ;;  %v3294_v3 = vpop.permute.xlu1 %3293 }
 0x37a   : > { %v3301_v5 = vsel %vm1697_vm9, %v3292_v0, %v3294_v3 }
 0x37b   : > { %v3309_v45 = vsel %vm2139_vm12, %v3301_v5, 0 }
 0x37d   : > { %v3296_v40 = vpop.permute.xlu0 %3295  ;;  %v3298_v47 = vpop.permute.xlu1 %3297 }
 0x37e   : > { %v3302_v41 = vsel %vm1697_vm9, %v3294_v3, %v3296_v40  ;;  %v3303_v50 = vsel %vm1697_vm9, %v3296_v40, %v3298_v47 }
 0x37f   : > { %4082 = vmatmul.mubr.msk.bf16.vlgmr.msra.gmra.mrb[8].mxu1 %vm2202_vm10, %v4078_v44  ;;  %v3315_v61 = vsel %vm2139_vm12, %v3303_v50, 0 }
 0x380   : > { %4252 = vmatpush3.bf16.msra.mxu1 %v2516_v57  ;;  %4253 = vmatprep.mubr.msk.bf16.mxu1 %vm4731_vm3, %v4730_v29 }
 0x381   : > { %4085 = vmatprep.subr.msk.bf16.mxu1 %vm2139_vm12, %v2658_v53  ;;  %v4108_v53 = vld [vmem:[%s5698_s4 + $0x1c] sm:$0xf]  ;;  %v3453_v57 = vpop.permute.xlu1 %3452 }
 0x387   : > { %4254 = vmatmul.mubr.msk.bf16.vlgmr.msra.gmra.mrb[12].mxu1 %vm2202_vm10, %v4078_v44  ;;  %v3300_v44 = vpop.permute.xlu0 %3299 }
 0x388   : > { %2680 = vmatpush1.bf16.msra.mxu1 %v2665_v1  ;;  %2711 = vmatprep.mubr.bf16.mxu1 %v4721_v6  ;;  %v3304_v48 = vsel %vm1697_vm9, %v3298_v47, %v3300_v44  ;;  %v3457_v1 = vpop.permute.xlu1 %3456  ;;  %v3719_v47 = vld [vmem:[%s5702_s8 + $0x8] sm:$0xff] }
 0x389   : > { %4087 = vmatprep.subr.msk.bf16.mxu1 %vm2139_vm12, %v2660_v8  ;;  %v3321_v8 = vsel %vm2139_vm12, %v3300_v44, 0 }
 0x38b   : > { %v3455_v63 = vpop.permute.xlu0 %3454 }
 0x38c   : > { %v3463_v7 = vsel %vm5726_vm4, %v3455_v63, %v3457_v1  ;;  %v3462_v9 = vsel %vm5727_vm5, %v3453_v57, %v3455_v63  ;;  %vm3866_vm4 = vcmask 523648   ;;  %vm3872_vm5 = vcmask 654848  }
 0x38d   : > { %v3470_v11 = vsel %vm2139_vm12, %v3462_v9, 0 }
 0x38f   : > { %4086 = vmatmul.mubr.msk.bf16.vlgmr.msra.gmra.mrb[4].mxu1 %vm2202_vm10, %v4084_v10 }
 0x390   : > { %2721 = vmatpush1.bf16.msra.mxu1 %v2671_v12  ;;  %2752 = vmatprep.mubr.bf16.mxu1 %v4721_v6  ;;  %v3459_v12 = vpop.permute.xlu0 %3458 }
 0x391   : > { %4257 = vmatprep.subr.bf16.mxu1 %v4730_v29  ;;  %v3464_v14 = vsel %vm5729_vm7, %v3457_v1, %v3459_v12  ;;  %vm3884_vm7 = vcmask 917248  }
 0x397   : > { %4088 = vmatmul.mubr.msk.bf16.vlgmr.msra.gmra.mrb[8].mxu1 %vm2202_vm10, %v4084_v10 }
 0x398   : > { %4258 = vmatpush3.bf16.msra.mxu1 %v2677_v15  ;;  %4259 = vmatprep.mubr.msk.bf16.mxu1 %vm4731_vm3, %v4730_v29  ;;  %v3476_v15 = vsel %vm2139_vm12, %v3464_v14, 0 }
 0x399   : > { %4091 = vmatprep.subr.msk.bf16.mxu1 %vm2139_vm12, %v2819_v4  ;;  %v4114_v4 = vld [vmem:[%s5698_s4 + $0x20] sm:$0xf] }
 0x39a   : > { %v3615_v17 = vpop.permute.xlu0 %3614 }
 0x39f   : > { %4260 = vmatmul.mubr.msk.bf16.vlgmr.msra.gmra.mrb[12].mxu1 %vm2202_vm10, %v4084_v10  ;;  %v3461_v10 = vpop.permute.xlu1 %3460 }
 0x3a0   : > { %2841 = vmatpush1.bf16.msra.mxu1 %v2826_v20  ;;  %2872 = vmatprep.mubr.bf16.mxu1 %v4721_v6  ;;  %v3465_v13 = vsel %vm5728_vm6, %v3459_v12, %v3461_v10  ;;  %v3482_v16 = vsel %vm2139_vm12, %v3461_v10, 0  ;;  %vm3878_vm6 = vcmask 786048  }
 0x3a1   : > { %4093 = vmatprep.subr.msk.bf16.mxu1 %vm2139_vm12, %v2821_v22 }
 0x3a3   : > { %v3626_v19 = vpop.permute.xlu1 %3625 }
 0x3a7   : > { %4092 = vmatmul.mubr.msk.bf16.vlgmr.msra.gmra.mrb[4].mxu1 %vm2202_vm10, %v4090_v24 }
 0x3a8   : > { %2882 = vmatpush1.bf16.msra.mxu1 %v2832_v26  ;;  %2913 = vmatprep.mubr.bf16.mxu1 %v4721_v6 }
 0x3a9   : > { %4263 = vmatprep.subr.bf16.mxu1 %v4730_v29 }
 0x3af   : > { %4094 = vmatmul.mubr.msk.bf16.vlgmr.msra.gmra.mrb[8].mxu1 %vm2202_vm10, %v4090_v24 }
 0x3b0   : > { %4264 = vmatpush3.bf16.msra.mxu1 %v2838_v31  ;;  %4265 = vmatprep.mubr.msk.bf16.mxu1 %vm4731_vm3, %v4730_v29 }
 0x3b1   : > { %4097 = vmatprep.subr.msk.bf16.mxu1 %vm2139_vm12, %v2980_v30 }
 0x3b7   : > { %4266 = vmatmul.mubr.msk.bf16.vlgmr.msra.gmra.mrb[12].mxu1 %vm2202_vm10, %v4090_v24 }
 0x3b8   : > { %3002 = vmatpush1.bf16.msra.mxu1 %v2987_v34  ;;  %3033 = vmatprep.mubr.bf16.mxu1 %v4721_v6 }
 0x3b9   : > { %4099 = vmatprep.subr.msk.bf16.mxu1 %vm2139_vm12, %v2982_v36 }
 0x3bf   : > { %4098 = vmatmul.mubr.msk.bf16.vlgmr.msra.gmra.mrb[4].mxu1 %vm2202_vm10, %v4096_v42 }
 0x3c0   : > { %3043 = vmatpush1.bf16.msra.mxu1 %v2993_v49  ;;  %3074 = vmatprep.mubr.bf16.mxu1 %v4721_v6 }
 0x3c1   : > { %4269 = vmatprep.subr.bf16.mxu1 %v4730_v29 }
 0x3c7   : > { %4100 = vmatmul.mubr.msk.bf16.vlgmr.msra.gmra.mrb[8].mxu1 %vm2202_vm10, %v4096_v42 }
 0x3c8   : > { %4270 = vmatpush3.bf16.msra.mxu1 %v2999_v39  ;;  %4271 = vmatprep.mubr.msk.bf16.mxu1 %vm4731_vm3, %v4730_v29 }
 0x3c9   : > { %4103 = vmatprep.subr.msk.bf16.mxu1 %vm2139_vm12, %v3141_v38 }
 0x3cf   : > { %4272 = vmatmul.mubr.msk.bf16.vlgmr.msra.gmra.mrb[12].mxu1 %vm2202_vm10, %v4096_v42 }
 0x3d0   : > { %3163 = vmatpush1.bf16.msra.mxu1 %v3148_v56  ;;  %3194 = vmatprep.mubr.bf16.mxu1 %v4721_v6 }
 0x3d1   : > { %4105 = vmatprep.subr.msk.bf16.mxu1 %vm2139_vm12, %v3143_v59 }
 0x3d7   : > { %4104 = vmatmul.mubr.msk.bf16.vlgmr.msra.gmra.mrb[4].mxu1 %vm2202_vm10, %v4102_v62 }
 0x3d8   : > { %3204 = vmatpush1.bf16.msra.mxu1 %v3154_v2  ;;  %3235 = vmatprep.mubr.bf16.mxu1 %v4721_v6 }
 0x3d9   : > { %4275 = vmatprep.subr.bf16.mxu1 %v4730_v29 }
 0x3df   : > { %4106 = vmatmul.mubr.msk.bf16.vlgmr.msra.gmra.mrb[8].mxu1 %vm2202_vm10, %v4102_v62 }
 0x3e0   : > { %4276 = vmatpush3.bf16.msra.mxu1 %v3160_v46  ;;  %4277 = vmatprep.mubr.msk.bf16.mxu1 %vm4731_vm3, %v4730_v29 }
 0x3e1   : > { %4109 = vmatprep.subr.msk.bf16.mxu1 %vm2139_vm12, %v3302_v41 }
 0x3e7   : > { %4278 = vmatmul.mubr.msk.bf16.vlgmr.msra.gmra.mrb[12].mxu1 %vm2202_vm10, %v4102_v62 }
 0x3e8   : > { %3324 = vmatpush1.bf16.msra.mxu1 %v3309_v45  ;;  %3355 = vmatprep.mubr.bf16.mxu1 %v4721_v6  ;;  %v3718_v45 = vld [vmem:[%s5702_s8] sm:$0xff] }
 0x3e9   : > { %4111 = vmatprep.subr.msk.bf16.mxu1 %vm2139_vm12, %v3304_v48  ;;  %v3720_v48 = vld [vmem:[%s5702_s8 + $0x10] sm:$0xff]  ;;  %v4313_v50 = vpack.c.bf16 %v3719_v47, %v3718_v45 }
 0x3eb   : > { %4314 = vmatprep.subr.bf16.mxu0 %v4313_v50 }
 0x3ec   : > { %4316 = vmatpush3.bf16.msra.mxu0 %v4313_v50 }
 0x3ef   : > { %4110 = vmatmul.mubr.msk.bf16.vlgmr.msra.gmra.mrb[4].mxu1 %vm2202_vm10, %v4108_v53 }
 0x3f0   : > { %3365 = vmatpush1.bf16.msra.mxu1 %v3315_v61  ;;  %3396 = vmatprep.mubr.bf16.mxu1 %v4721_v6 }
 0x3f1   : > { %4281 = vmatprep.subr.bf16.mxu1 %v4730_v29 }
 0x3f7   : > { %4112 = vmatmul.mubr.msk.bf16.vlgmr.msra.gmra.mrb[8].mxu1 %vm2202_vm10, %v4108_v53 }
 0x3f8   : > { %4282 = vmatpush3.bf16.msra.mxu1 %v3321_v8  ;;  %4283 = vmatprep.mubr.msk.bf16.mxu1 %vm4731_vm3, %v4730_v29 }
 0x3f9   : > { %4115 = vmatprep.subr.msk.bf16.mxu1 %vm2139_vm12, %v3463_v7 }
 0x3ff   : > { %4284 = vmatmul.mubr.msk.bf16.vlgmr.msra.gmra.mrb[12].mxu1 %vm2202_vm10, %v4108_v53  ;;  %v3721_v53 = vld [vmem:[%s5702_s8 + $0x18] sm:$0x7f] }
 0x400   : > { %3485 = vmatpush1.bf16.msra.mxu1 %v3470_v11  ;;  %3516 = vmatprep.mubr.bf16.mxu1 %v4721_v6  ;;  %v4317_v61 = vpack.c.bf16 %v3721_v53, %v3720_v48 }
 0x401   : > { %4117 = vmatprep.subr.msk.bf16.mxu1 %vm2139_vm12, %v3465_v13 }
 0x402   : > { %4319 = vmatprep.subr.msk.bf16.mxu0 %vm4318_vm1, %v4317_v61 }
 0x403   : > { %4322 = vmatpush3.bf16.msk.msra.mxu0 %vm4318_vm1, %v4317_v61 }
 0x407   : > { %4116 = vmatmul.mubr.msk.bf16.vlgmr.msra.gmra.mrb[4].mxu1 %vm2202_vm10, %v4114_v4 }
 0x408   : > { %3526 = vmatpush1.bf16.msra.mxu1 %v3476_v15  ;;  %3557 = vmatprep.mubr.bf16.mxu1 %v4721_v6 }
 0x409   : > { %4287 = vmatprep.subr.bf16.mxu1 %v4730_v29 }
 0x40f   : > { %4118 = vmatmul.mubr.msk.bf16.vlgmr.msra.gmra.mrb[8].mxu1 %vm2202_vm10, %v4114_v4 }
 0x410   : > { %4288 = vmatpush3.bf16.msra.mxu1 %v3482_v16  ;;  %4289 = vmatprep.mubr.msk.bf16.mxu1 %vm4731_vm3, %v4730_v29 }
 0x417   : > { %4290 = vmatmul.mubr.msk.bf16.vlgmr.msra.gmra.mrb[12].mxu1 %vm2202_vm10, %v4114_v4  ;;  %vm3860_vm10 = vcmask 392448  }
 0x4da   : > { %v3518_v18 = vpop.f32.mrb[4].mxu1 }
 0x4db   : > { %v3617_v20 = vmul.f32 %v3615_v17, %v3518_v18  ;;  %v3520_v21 = vpop.f32.mrb[5].mxu1 }
 0x4dc   : > { %v3618_v22 = vmul.f32 %v3615_v17, %v3520_v21  ;;  %v3522_v23 = vpop.f32.mrb[6].mxu1 }
 0x4dd   : > { %v3523_v6 = vpop.f32.mrb[7].mxu1  ;;  %v3628_v24 = vadd.f32 %v3626_v19, %v3617_v20 }
 0x4de   : > { %v3629_v25 = vadd.f32 %v3626_v19, %v3618_v22 }
 0x4df   : > { %vm3633_vm9 = vcmp.gt.f32.partialorder %v3628_v24, 0.0  ;;  %v3638_v26 = vmul.f32 0.01, %v3628_v24 }
 0x4e0   : > { %vm3634_vm11 = vcmp.gt.f32.partialorder %v3629_v25, 0.0  ;;  %v3639_v27 = vmul.f32 0.01, %v3629_v25 }
 0x4e1   : > { %v3643_v28 = vsel %vm3633_vm9, %v3628_v24, %v3638_v26  ;;  %vm3890_vm9 = vcmask 1048448  }
 0x4e2   : > { %3653 = vrot.lane.b32.xlu1 %v3643_v28, %s4724_s20  ;;  %v3559_v29 = vpop.f32.mrb[8].mxu1  ;;  %v3644_v30 = vsel %vm3634_vm11, %v3629_v25, %v3639_v27 }
 0x4e3   : > { %v3619_v31 = vmul.f32 %v3615_v17, %v3559_v29  ;;  %3655 = vrot.lane.b32.xlu0 %v3644_v30, %s4724_s20  ;;  %v3561_v32 = vpop.f32.mrb[9].mxu1 }
 0x4e4   : > { %v3620_v33 = vmul.f32 %v3615_v17, %v3561_v32  ;;  %v3563_v34 = vpop.f32.mrb[10].mxu1 }
 0x4e5   : > { %v3630_v35 = vadd.f32 %v3626_v19, %v3619_v31  ;;  %v3564_v36 = vpop.f32.mrb[11].mxu1 }
 0x4e6   : > { %v3631_v37 = vadd.f32 %v3626_v19, %v3620_v33 }
 0x4e7   : > { %vm3635_vm3 = vcmp.gt.f32.partialorder %v3630_v35, 0.0  ;;  %v3640_v42 = vmul.f32 0.01, %v3630_v35 }
 0x4e8   : > { %vm3636_vm12 = vcmp.gt.f32.partialorder %v3631_v37, 0.0  ;;  %v3641_v43 = vmul.f32 0.01, %v3631_v37 }
 0x4e9   : > { %v3645_v49 = vsel %vm3635_vm3, %v3630_v35, %v3640_v42 }
 0x4ea   : > { %3657 = vrot.lane.b32.xlu1 %v3645_v49, %s4724_s20  ;;  %v3600_v51 = vpop.f32.mrb[12].mxu1  ;;  %v3646_v52 = vsel %vm3636_vm12, %v3631_v37, %v3641_v43 }
 0x4eb   : > { %v3621_v38 = vmul.f32 %v3615_v17, %v3600_v51  ;;  %3659 = vrot.lane.b32.xlu0 %v3646_v52, %s4724_s20  ;;  %v4291_v39 = vpop.f32.mrb[13].mxu1 }
 0x4ec   : > { %v3603_v54 = vpop.f32.mrb[14].mxu1 }
 0x4ed   : > { %v3632_v55 = vadd.f32 %v3626_v19, %v3621_v38  ;;  %v4292_v56 = vpop.f32.mrb[15].mxu1 }
 0x4ef   : > { %vm3637_vm13 = vcmp.gt.f32.partialorder %v3632_v55, 0.0  ;;  %v3642_v58 = vmul.f32 0.01, %v3632_v55 }
 0x4f1   : > { %v3647_v59 = vsel %vm3637_vm13, %v3632_v55, %v3642_v58 }
 0x4f2   : > { %3661 = vrot.lane.b32.xlu1 %v3647_v59, %s4724_s20  ;;  %s4736_s20 = smov 120  }
 0x554   : > { %v3654_v60 = vpop.permute.xlu1 %3653 }
 0x555   : > { %v3656_v62 = vpop.permute.xlu0 %3655 }
 0x556   : > { %v3664_v0 = vsel %vm921_vm8, %v3654_v60, %v3656_v62 }
 0x557   : > { %v3672_v2 = vmax.f32 %v3643_v28, %v3664_v0 }
 0x559   : > { %3680 = vrot.lane.b32.xlu0 %v3672_v2, %s4722_s28 }
 0x55c   : > { %v3658_v3 = vpop.permute.xlu1 %3657 }
 0x55d   : > { %v3665_v40 = vsel %vm921_vm8, %v3656_v62, %v3658_v3  ;;  %v3660_v41 = vpop.permute.xlu0 %3659 }
 0x55e   : > { %v3666_v46 = vsel %vm921_vm8, %v3658_v3, %v3660_v41  ;;  %v3673_v5 = vmax.f32 %v3644_v30, %v3665_v40 }
 0x55f   : > { %v3674_v44 = vmax.f32 %v3645_v49, %v3666_v46 }
 0x560   : > { %3682 = vrot.lane.b32.xlu1 %v3673_v5, %s4722_s28 }
 0x561   : > { %3684 = vrot.lane.b32.xlu0 %v3674_v44, %s4722_s28 }
 0x564   : > { %v3662_v57 = vpop.permute.xlu1 %3661 }
 0x565   : > { %v3667_v63 = vsel %vm921_vm8, %v3660_v41, %v3662_v57  ;;  %vm3854_vm8 = vcmask 261248  }
 0x566   : > { %v3675_v1 = vmax.f32 %v3646_v52, %v3667_v63 }
 0x568   : > { %3686 = vrot.lane.b32.xlu1 %v3675_v1, %s4722_s28  ;;  %s4738_s28 = smov 44  }
 0x5cb   : > { %v3681_v7 = vpop.permute.xlu0 %3680 }
 0x5d2   : > { %v3683_v8 = vpop.permute.xlu1 %3682 }
 0x5d3   : > { %v3689_v9 = vsel %vm401_vm0, %v3681_v7, %v3683_v8  ;;  %v3685_v10 = vpop.permute.xlu0 %3684 }
 0x5d4   : > { %v3690_v11 = vsel %vm401_vm0, %v3683_v8, %v3685_v10  ;;  %v3696_v12 = vmax.f32 %v3672_v2, %v3689_v9 }
 0x5d5   : > { %v3697_v13 = vmax.f32 %v3673_v5, %v3690_v11 }
 0x5d6   : > { %3701 = vrot.lane.b32.xlu0 %v3696_v12, %s5723_s19  ;;  %4301 = vmatprep.mubr.msk.f32.mxu0 %vm3722_vm2, %v3696_v12  ;;  %s4742_s19 = smov 16  }
 0x5d7   : > { %3704 = vrot.lane.b32.xlu1 %v3697_v13, %s4736_s20  ;;  %s4746_s20 = smov 64  }
 0x5da   : > { %3706 = vrot.lane.b32.xlu0 %v3697_v13, %s4737_s21  ;;  %v3687_v14 = vpop.permute.xlu1 %3686  ;;  %s4747_s21 = smov 96  }
 0x5db   : > { %v3691_v4 = vsel %vm401_vm0, %v3685_v10, %v3687_v14  ;;  %v3699_v16 = vmax.f32 %v3675_v1, %v3687_v14  ;;  %vm3848_vm0 = vcmask 130048  }
 0x5dc   : > { %v3698_v15 = vmax.f32 %v3674_v44, %v3691_v4 }
 0x5de   : > { %3711 = vrot.lane.b32.xlu0 %v3698_v15, %s4738_s28  ;;  %3709 = vrot.lane.b32.xlu1 %v3698_v15, %s4739_s26  ;;  %s4130_s28 = sshll.u32 %s4706_s13, 1 }
 0x5e2   : > { %3716 = vrot.lane.b32.xlu0 %v3699_v16, %s4740_s15  ;;  %3714 = vrot.lane.b32.xlu1 %v3699_v16, %s4741_s25  ;;  %s3908_s25 = sshll.u32 %s5303_s17, 4  ;;  %s5639_s25 = int_to_ptr.vmem [resolvable:$true] %s3908_s25 }
 0x648   : > { %v3702_v17 = vpop.permute.xlu0 %3701 }
 0x649   : > { %4302 = vmatmul.mubr.msk.f32.vlgmr.msra.gmra.mrb[12].mxu0 %vm3722_vm2, %v3702_v17  ;;  %v3705_v18 = vpop.permute.xlu1 %3704 }
 0x64a   : > { %4304 = vmatprep.mubr.msk.f32.mxu0 %vm3722_vm2, %v3705_v18 }
 0x64c   : > { %v3707_v19 = vpop.permute.xlu0 %3706 }
 0x64d   : > { %4305 = vmatmul.mubr.msk.f32.gmra.mrb[14].mxu0 %vm3722_vm2, %v3707_v19 }
 0x650   : > { %v3712_v20 = vpop.permute.xlu0 %3711  ;;  %v3710_v21 = vpop.permute.xlu1 %3709 }
 0x651   : > { %4307 = vmatprep.mubr.msk.f32.mxu0 %vm3722_vm2, %v3710_v21 }
 0x652   : > { %4308 = vmatmul.mubr.msk.f32.gmra.mrb[16].mxu0 %vm3722_vm2, %v3712_v20 }
 0x654   : > { %v3717_v22 = vpop.permute.xlu0 %3716  ;;  %v3715_v23 = vpop.permute.xlu1 %3714 }
 0x655   : > { %4310 = vmatprep.mubr.msk.f32.mxu0 %vm3722_vm2, %v3715_v23 }
 0x656   : > { %4311 = vmatmul.mubr.msk.f32.gmra.mrb[18].mxu0 %vm3722_vm2, %v3717_v22 }
 0x71c   : > { %v4303_v6 = vpop.f32.mrb[12].mxu0 }
 0x71d   : > { %v3809_v24 = vpop.f32.mrb[13].mxu0  ;;  %3851 = vrot.lane.b32.xlu1 %v4303_v6, %s4742_s19 }
 0x71e   : > { %3849 = vst.msk [vmem:[%s5303_s17] sm:$0xff] %vm3848_vm0, %v3809_v24 }
 0x720   : > { %v4306_v25 = vpop.f32.mrb[14].mxu0 }
 0x721   : > { %3863 = vrot.lane.b32.xlu1 %v4306_v25, %s4743_s29  ;;  %v3819_v26 = vpop.f32.mrb[15].mxu0 }
 0x722   : > { %3857 = vrot.lane.b32.xlu0 %v3819_v26, %s4744_s18 }
 0x725   : > { %v4309_v27 = vpop.f32.mrb[16].mxu0 }
 0x726   : > { %3875 = vrot.lane.b32.xlu1 %v4309_v27, %s4745_s24  ;;  %v3829_v28 = vpop.f32.mrb[17].mxu0  ;;  %s4624_s24 = scalar_lea.vmem %s5639_s25, 128 }
 0x727   : > { %3869 = vrot.lane.b32.xlu0 %v3829_v28, %s4746_s20  ;;  %p4625_p2 = scmp.ne.s32.totalorder %s5639_s25, %s4624_s24  ;;  %s4748_s20 = smov [#allocation3]  }
 0x729   : > { %v4312_v29 = vpop.f32.mrb[18].mxu0  ;;  %p4626_p4 = pnand %p4625_p2, %p4850_p3 }
 0x72a   : > { %3887 = vrot.lane.b32.xlu1 %v4312_v29, %s4739_s26  ;;  %v3839_v30 = vpop.f32.mrb[19].mxu0  ;;  %s3904_s26 = sadd.s32 %s4702_s12, %s4130_s28  ;;  %s5730_s12 = sand.u32 1, %s4694_s10  }
 0x72b   : > { %3881 = vrot.lane.b32.xlu0 %v3839_v30, %s4747_s21  ;;  %s4131_s15 = sshll.u32 %s3904_s26, 7  ;;  %s3893_s18 = scalar_lea.sflag [#allocation4], %s5730_s12 }
 0x72c   : > { %s5637_s29 = scalar_lea.hbm %s5703_s9, %s4131_s15  ;;  %p4627_p5 = pneg %p4626_p4 }
 0x72d   : > { %s4628_s21 = sshll.u32 %s4748_s20, 4  ;;  %s4629_s21 = int_to_ptr.vmem [resolvable:$false] %s4628_s21 }
 0x72e   : > { %s4630_s28 = scalar_lea.vmem %s4629_s21, 256  ;;  %p4631_p6 = scmp.lt.s32.totalorder %s5639_s25, %s4629_s21 }
 0x72f   : > { %p4632_p7 = scmp.lt.s32.totalorder %s4630_s28, %s4624_s24 }
 0x731   : > { %p4633_p9 = por %p4632_p7, %p4631_p6 }
 0x733   : > { %p4634_p10 = pnand %p4633_p9, %p4627_p5 }
 0x78f   : > { %v3852_v31 = vpop.permute.xlu1 %3851 }
 0x790   : > { %3855 = vst.msk [vmem:[%s5303_s17] sm:$0xff] %vm3854_vm8, %v3852_v31 }
 0x793   : > { %v3864_v32 = vpop.permute.xlu1 %3863 }
 0x794   : > { %v3858_v33 = vpop.permute.xlu0 %3857 }
 0x795   : > { %3861 = vst.msk [vmem:[%s5303_s17] sm:$0xff] %vm3860_vm10, %v3858_v33 }
 0x796   : > { %3867 = vst.msk [vmem:[%s5303_s17] sm:$0xff] %vm3866_vm4, %v3864_v32 }
 0x798   : > { %v3876_v34 = vpop.permute.xlu1 %3875 }
 0x799   : > { %v3870_v35 = vpop.permute.xlu0 %3869 }
 0x79a   : > { %3873 = vst.msk [vmem:[%s5303_s17] sm:$0xff] %vm3872_vm5, %v3870_v35 }
 0x79b   : > { %3879 = vst.msk [vmem:[%s5303_s17] sm:$0xff] %vm3878_vm6, %v3876_v34 }
 0x79c   : > { %v3888_v37 = vpop.permute.xlu1 %3887 }
 0x79d   : > { %v3882_v36 = vpop.permute.xlu0 %3881 }
 0x79e   : > { %3885 = vst.msk [vmem:[%s5303_s17] sm:$0xff] %vm3884_vm7, %v3882_v36 }
 0x79f   : > { %3891 = vst.msk [vmem:[%s5303_s17] sm:$0xff] %vm3890_vm9, %v3888_v37 }
 0x7a0   : > { %4637 = shalt.err (!%p4634_p10)
}
 0x7a1   : > { %s4638_s17 = scalar_lea.hbm %s5637_s29, 128  ;;  %s4642_s19 = scalar_lea.hbm %s5703_s9, 512 }
 0x7a2   : > { %p4639_p11 = scmp.ne.s32.totalorder %s5637_s29, %s4638_s17  ;;  %p4643_p0 = scmp.lt.u32.totalorder %s5637_s29, %s5703_s9 }
 0x7a3   : > { %p4644_p1 = scmp.lt.u32.totalorder %s4642_s19, %s4638_s17  ;;  %p4646_p4 = scmp.lt.u32.totalorder %s4638_s17, %s5637_s29 }
 0x7a4   : > { %p4640_p12 = pnand %p4639_p11, %p4850_p3 }
 0x7a5   : > { %p4645_p2 = por %p4644_p1, %p4643_p0 }
 0x7a6   : > { %p4641_p13 = pneg %p4640_p12 }
 0x7a7   : > { %p4647_p5 = por %p4646_p4, %p4645_p2 }
 0x7a9   : > { %p4648_p6 = pnand %p4647_p5, %p4641_p13 }
 0x7ab   : > { %4651 = shalt.err (!%p4648_p6)
}
 0x7ac   : > { %4515 = dma.vmem_to_hbm [thread:$0]  (%p4850_p3), %s5639_s25, 128, %s5637_s29, %s3893_s18  }
 0x7ad PF: > { %p4521_p7 = scmp.ge.s32.totalorder %s4718_s16, 2  ;;  %s3920_s24 = sand.u32 1, %s4690_s30  }
 0x7ae   : > { %s3921_s20 = scalar_lea.sflag [#allocation4], %s3920_s24 }
 0x7af   : > { %p4518_p9 = pnand %p4521_p7, %p4859_p8 }
 0x7b1   : > { %4685 = dma.done.wait (!%p4518_p9), %s3921_s20, 128  }
 0x7b2   : > { %4687 = vsyncadd (!%p4518_p9), %s3921_s20, 4294967168  ;;  %s22_s16 = sadd.s32 1, %s4718_s16   ;;  %s5731_s13 = sld [smem:[#allocation6_spill]] }
 0x7b3   : > { %p19_p10 = scmp.ge.s32.totalorder %s22_s16, 6   ;;  %s5732_s22 = sld [smem:[#allocation7_spill]] }
 0x7b4   : > { %s5733_s15 = sld [smem:[#allocation8_spill]]  ;;  %s5734_s30 = smov %s4694_s10 }
 0x7b5   : > { %s5735_s10 = smov %s4698_s11  ;;  %s5736_s11 = smov %s4868_s27 }
 0x7b6   : > { %s5737_s12 = smov %s4710_s14  ;;  %21 = sbr.rel (!%p19_p10) target bundleno = 5 (0x5), region = 115 }
 0x7b9   : > { %s5738_s14 = smov %s5732_s22 }
 0x7bd   :  { %3926 = vsyncpa [#allocation4], 1 }
 0x7be   :  { %3928 = vsyncpa [#allocation4 + $0x1], 1 }

</bundles_post_ra>
